<compile_context>
chip_gen: v6e
topology: v6e:2x2x1
jax: 0.10.0
libtpu: 0.0.40
codegen_flags: <defaults>
</compile_context>

<pallas_src>
import functools

import jax
import jax.numpy as jnp
from jax.experimental import pallas as pl
from jax.experimental.pallas import tpu as pltpu


def _round_up(n, m):
    return ((n + m - 1) // m) * m


def _cdiv(a, b):
    return (a + b - 1) // b


def _pad2d(a, rows, cols):
    return jnp.pad(a, ((0, rows - a.shape[0]), (0, cols - a.shape[1])))


def _detect_num_tensorcores():
    """Best-effort TensorCore count (v5e/v6e: 1, v7x: 2). Falls back to 1."""
    try:
        info = pltpu.get_tpu_info()
    except Exception:
        return 1
    for attr in ("num_cores", "tensorcore_count", "num_tensorcores",
                 "core_count", "cores_per_chip"):
        v = getattr(info, attr, None)
        if isinstance(v, int) and v > 0:
            return v
    return 1


# --------------------------------------------------------------------------- kernel
def _make_encoder_kernel(n_hidden):
    """Fused forward: [Linear+ReLU]*n -> fused (fc1|fc2) matmul -> mu, std, logvar."""

    def kernel(*refs):
        # refs: x, (W_i, b_i)*n_hidden, W_head, b_head, mu_out, std_out, logvar_out
        x_ref = refs[0]
        h = x_ref[...]

        idx = 1
        for _ in range(n_hidden):
            w = refs[idx][...]
            b = refs[idx + 1][...]
            acc = jnp.dot(h, w, preferred_element_type=jnp.float32) + b  # f32 acc
            acc = jnp.maximum(acc, 0.0)          # ReLU (VPU)
            h = acc.astype(w.dtype)              # keep MXU inputs in compute dtype
            idx += 2

        w_head = refs[idx][...]
        b_head = refs[idx + 1][...]
        mu_ref = refs[idx + 2]
        std_ref = refs[idx + 3]
        lv_ref = refs[idx + 4]

        e_pad = w_head.shape[1] // 2
        # One fused matmul for both heads: cols [0:e_pad) = mu, [e_pad:) = logvar.
        out = jnp.dot(h, w_head, preferred_element_type=jnp.float32) + b_head
        mu = out[:, :e_pad]            # 128-aligned slice boundaries
        logvar = out[:, e_pad:]

        mu_ref[...] = mu.astype(mu_ref.dtype)
        lv_ref[...] = logvar.astype(lv_ref.dtype)
        # exp runs on the EUP (its own VLIW slot): effectively free next to stores.
        std_ref[...] = jnp.exp(0.5 * logvar).astype(std_ref.dtype)

    return kernel


# ------------------------------------------------------------------- params prep
def init_encoder_params(key, data_dim, compress_dims, embedding_dim):
    """Deterministic parameter init (small normal weights, zero biases)."""
    params = []
    dim = data_dim
    keys = jax.random.split(key, len(compress_dims) + 2)
    for i, h in enumerate(compress_dims):
        w = jax.random.normal(keys[i], (dim, h), dtype=jnp.float32) * 0.1
        b = jnp.zeros((1, h), dtype=jnp.float32)
        params.append((w, b))
        dim = h
    w_mu = jax.random.normal(keys[-2], (dim, embedding_dim), dtype=jnp.float32) * 0.1
    b_mu = jnp.zeros((1, embedding_dim), dtype=jnp.float32)
    w_lv = jax.random.normal(keys[-1], (dim, embedding_dim), dtype=jnp.float32) * 0.1
    b_lv = jnp.zeros((1, embedding_dim), dtype=jnp.float32)
    return params, (w_mu, b_mu), (w_lv, b_lv)


def prepare_encoder_params(hidden_params, mu_params, lv_params, *,
                           compute_dtype=jnp.bfloat16):
    """ONE-TIME prep: zero-pad every feature dim to a multiple of 128, fuse fc1|fc2.

    Zero padding is exact: zero weight rows/cols contribute nothing and ReLU(0)=0.
    Weights are cast to `compute_dtype` (bf16 by default for the MXU); biases stay
    f32 (added to the f32 accumulator).  Returns a flat tuple of arrays to pass to
    `encoder_forward` -- this runs once, not on every forward call.
    """
    flat = []
    first_w = hidden_params[0][0] if hidden_params else mu_params[0]
    in_dim = _round_up(first_w.shape[0], 128)
    for (w, b) in hidden_params:
        h_pad = _round_up(w.shape[1], 128)
        flat.append(_pad2d(jnp.asarray(w), in_dim, h_pad).astype(compute_dtype))
        flat.append(_pad2d(jnp.asarray(b).reshape(1, -1), 1, h_pad).astype(jnp.float32))
        in_dim = h_pad

    E = mu_params[0].shape[1]
    e_pad = _round_up(E, 128)
    w_mu = _pad2d(jnp.asarray(mu_params[0]), in_dim, e_pad)
    w_lv = _pad2d(jnp.asarray(lv_params[0]), in_dim, e_pad)
    b_mu = _pad2d(jnp.asarray(mu_params[1]).reshape(1, -1), 1, e_pad)
    b_lv = _pad2d(jnp.asarray(lv_params[1]).reshape(1, -1), 1, e_pad)
    flat.append(jnp.concatenate([w_mu, w_lv], axis=1).astype(compute_dtype))
    flat.append(jnp.concatenate([b_mu, b_lv], axis=1).astype(jnp.float32))
    return tuple(jax.device_put(a) for a in flat)


# ----------------------------------------------------------------------- forward
def _choose_batch_tile(B, block_batch, sublane, num_cores):
    bb_cap = _round_up(min(block_batch, B), sublane)
    if num_cores <= 1 or B < num_cores * sublane:
        # Single TensorCore (v5e/v6e): the grid is a serial loop -- do not split a
        # launch-overhead-dominated kernel into extra steps.
        return bb_cap
    # Multi-TC (v7x): even, balanced parallel grid; num_cores * k full steps.
    k = max(1, _cdiv(B, num_cores * bb_cap))
    return _round_up(_cdiv(B, num_cores * k), sublane)


@functools.partial(
    jax.jit,
    static_argnames=("embedding_dim", "block_batch", "num_cores",
                     "weight_buffer_count"),
)
def encoder_forward(x, flat_params, *, embedding_dim, block_batch=1024,
                    num_cores=1, weight_buffer_count=None):
    """Runs the fused Pallas Encoder kernel.

    x: (B, data_dim) float32
    flat_params: output of `prepare_encoder_params` (pre-padded, pre-fused)
    Returns (mu, std, logvar), each (B, embedding_dim) float32.
    """
    flat = list(flat_params)
    n_hidden = (len(flat) - 2) // 2
    compute_dtype = flat[0].dtype
    d_pad = flat[0].shape[0]
    e_pad = flat[-1].shape[1] // 2

    B, data_dim = x.shape
    assert data_dim <= d_pad, "x feature dim larger than prepared weights"
    assert embedding_dim <= e_pad

    # bf16 packs 16 rows per sublane tile; f32 packs 8.
    sublane = 16 if compute_dtype == jnp.bfloat16 else 8
    bb = _choose_batch_tile(B, block_batch, sublane, num_cores)
    grid_steps = _cdiv(B, bb)                  # no rows silently dropped
    b_pad = grid_steps * bb

    # Only the activation is padded per call; weights were prepared once.
    x_p = _pad2d(x, b_pad, d_pad).astype(compute_dtype)

    x_spec = pl.BlockSpec((bb, d_pad), lambda i: (i, 0))
    if weight_buffer_count is None:
        w_specs = [pl.BlockSpec(w.shape, lambda i: (0, 0)) for w in flat]
    else:
        # Optional: shrink VMEM footprint of the constant-index (resident) weights.
        w_specs = [pl.BlockSpec(w.shape, lambda i: (0, 0),
                                pipeline_mode=pl.Buffered(weight_buffer_count))
                   for w in flat]
    out_spec = pl.BlockSpec((bb, e_pad), lambda i: (i, 0))

    out_shape = tuple(
        jax.ShapeDtypeStruct((b_pad, e_pad), jnp.float32) for _ in range(3)
    )

    # VMEM budget: double-buffered x/out tiles + resident weights, capped at 64 MiB
    # (safe on v7x which has the smallest physical VMEM).
    itemsize = jnp.dtype(compute_dtype).itemsize
    x_bytes = bb * d_pad * itemsize
    out_bytes = 3 * bb * e_pad * 4
    w_bytes = sum(int(a.size) * jnp.dtype(a.dtype).itemsize for a in flat)
    est = 2 * (x_bytes + out_bytes + w_bytes) + (2 << 20)
    vmem_limit = min(64 << 20, max(16 << 20, est))

    mu, std, logvar = pl.pallas_call(
        _make_encoder_kernel(n_hidden),
        out_shape=out_shape,
        grid_spec=pltpu.PrefetchScalarGridSpec(
            num_scalar_prefetch=0,
            grid=(grid_steps,),
            in_specs=[x_spec] + w_specs,
            out_specs=[out_spec, out_spec, out_spec],
        ),
        compiler_params=pltpu.CompilerParams(
            dimension_semantics=("parallel",),
            vmem_limit_bytes=vmem_limit,
        ),
    )(x_p, *flat)

    return (mu[:B, :embedding_dim],
            std[:B, :embedding_dim],
            logvar[:B, :embedding_dim])


def encoder_reference(x, hidden_params, mu_params, lv_params):
    """Pure-JAX reference of the PyTorch Encoder.forward."""
    h = x
    for (w, b) in hidden_params:
        h = jnp.maximum(h @ w + b, 0.0)
    mu = h @ mu_params[0] + mu_params[1]
    logvar = h @ lv_params[0] + lv_params[1]
    std = jnp.exp(0.5 * logvar)
    return mu, std, logvar


if __name__ == "__main__":
    # Small shapes consistent with the TVAE Encoder:
    #   data_dim=32, compress_dims=(64, 32), embedding_dim=16, batch=200
    # (batch not a multiple of the tile exercises the cdiv/padding path).
    batch = 200
    data_dim = 32
    compress_dims = (64, 32)
    embedding_dim = 16

    key = jax.random.PRNGKey(0)
    k_x, k_p = jax.random.split(key)
    x = jax.random.normal(k_x, (batch, data_dim), dtype=jnp.float32)

    hidden_params, mu_params, lv_params = init_encoder_params(
        k_p, data_dim, compress_dims, embedding_dim
    )
    mu_r, std_r, lv_r = encoder_reference(x, hidden_params, mu_params, lv_params)

    num_cores = _detect_num_tensorcores()   # 1 step on v5e/v6e, even split on v7x

    # --- f32 path: exact check against the pure-JAX reference --------------------
    params_f32 = prepare_encoder_params(
        hidden_params, mu_params, lv_params, compute_dtype=jnp.float32
    )
    mu, std, logvar = encoder_forward(
        x, params_f32, embedding_dim=embedding_dim, num_cores=num_cores
    )
    jax.block_until_ready((mu, std, logvar))
    assert mu.shape == (batch, embedding_dim)
    assert std.shape == (batch, embedding_dim)
    assert logvar.shape == (batch, embedding_dim)
    assert jnp.allclose(mu, mu_r, atol=1e-4), "mu mismatch (f32)"
    assert jnp.allclose(std, std_r, atol=1e-4), "std mismatch (f32)"
    assert jnp.allclose(logvar, lv_r, atol=1e-4), "logvar mismatch (f32)"

    # --- bf16 path (default): MXU-friendly compute, f32 accumulation -------------
    params_bf16 = prepare_encoder_params(hidden_params, mu_params, lv_params)
    mu_b, std_b, lv_b = encoder_forward(
        x, params_bf16, embedding_dim=embedding_dim, num_cores=num_cores
    )
    jax.block_until_ready((mu_b, std_b, lv_b))
    assert jnp.allclose(mu_b, mu_r, atol=5e-2, rtol=5e-2), "mu mismatch (bf16)"
    assert jnp.allclose(std_b, std_r, atol=5e-2, rtol=5e-2), "std mismatch (bf16)"
    assert jnp.allclose(lv_b, lv_r, atol=5e-2, rtol=5e-2), "logvar mismatch (bf16)"

    print("KERNEL_OK")
</pallas_src>

<mosaic_0001>
module attributes {stable_mosaic.version = 11 : i64} {
  func.func @kernel(%arg0: i32, %arg1: memref<200x128xf32, #tpu.memory_space<vmem>>, %arg2: memref<128x128xf32, #tpu.memory_space<vmem>>, %arg3: memref<1x128xf32, #tpu.memory_space<vmem>>, %arg4: memref<128x128xf32, #tpu.memory_space<vmem>>, %arg5: memref<1x128xf32, #tpu.memory_space<vmem>>, %arg6: memref<128x256xf32, #tpu.memory_space<vmem>>, %arg7: memref<1x256xf32, #tpu.memory_space<vmem>>, %arg8: memref<200x128xf32, #tpu.memory_space<vmem>>, %arg9: memref<200x128xf32, #tpu.memory_space<vmem>>, %arg10: memref<200x128xf32, #tpu.memory_space<vmem>>) attributes {dimension_semantics = [#tpu.dimension_semantics<parallel>], iteration_bounds = array<i64: 1>, scalar_prefetch = 0 : i64, scratch_operands = 0 : i64, tpu.core_type = #tpu.core_type<tc>, window_params = [{transform_indices = @transform_0, window_bounds = array<i64: 200, 128>}, {pipeline_mode = #tpu.pipeline_mode<synchronous>, transform_indices = @transform_1, window_bounds = array<i64: 128, 128>}, {pipeline_mode = #tpu.pipeline_mode<synchronous>, transform_indices = @transform_2, window_bounds = array<i64: 1, 128>}, {pipeline_mode = #tpu.pipeline_mode<synchronous>, transform_indices = @transform_3, window_bounds = array<i64: 128, 128>}, {pipeline_mode = #tpu.pipeline_mode<synchronous>, transform_indices = @transform_4, window_bounds = array<i64: 1, 128>}, {pipeline_mode = #tpu.pipeline_mode<synchronous>, transform_indices = @transform_5, window_bounds = array<i64: 128, 256>}, {pipeline_mode = #tpu.pipeline_mode<synchronous>, transform_indices = @transform_6, window_bounds = array<i64: 1, 256>}, {transform_indices = @transform_7, window_bounds = array<i64: 200, 128>}, {transform_indices = @transform_8, window_bounds = array<i64: 200, 128>}, {transform_indices = @transform_9, window_bounds = array<i64: 200, 128>}]} {
    %c0 = arith.constant 0 : index
    %c0_0 = arith.constant 0 : index
    %0 = vector.load %arg1[%c0, %c0_0] : memref<200x128xf32, #tpu.memory_space<vmem>>, vector<200x128xf32>
    %c0_1 = arith.constant 0 : index
    %c0_2 = arith.constant 0 : index
    %1 = vector.load %arg2[%c0_1, %c0_2] : memref<128x128xf32, #tpu.memory_space<vmem>>, vector<128x128xf32>
    %c0_3 = arith.constant 0 : index
    %c0_4 = arith.constant 0 : index
    %2 = vector.load %arg3[%c0_3, %c0_4] : memref<1x128xf32, #tpu.memory_space<vmem>>, vector<1x128xf32>
    %cst = arith.constant dense<0.000000e+00> : vector<200x128xf32>
    %3 = tpu.matmul %0, %1, %cst {dimension_numbers = #tpu.dot_dimension_numbers<[1], [0], [0], [1], [0, 0, 1, 1], [], []>} : vector<200x128xf32>, vector<128x128xf32>, vector<200x128xf32> -> vector<200x128xf32>
    %4 = vector.broadcast %2 : vector<1x128xf32> to vector<200x128xf32>
    %5 = arith.addf %3, %4 : vector<200x128xf32>
    %cst_5 = arith.constant 0.000000e+00 : f32
    %6 = vector.broadcast %cst_5 : f32 to vector<200x128xf32>
    %7 = arith.maximumf %5, %6 : vector<200x128xf32>
    %c0_6 = arith.constant 0 : index
    %c0_7 = arith.constant 0 : index
    %8 = vector.load %arg4[%c0_6, %c0_7] : memref<128x128xf32, #tpu.memory_space<vmem>>, vector<128x128xf32>
    %c0_8 = arith.constant 0 : index
    %c0_9 = arith.constant 0 : index
    %9 = vector.load %arg5[%c0_8, %c0_9] : memref<1x128xf32, #tpu.memory_space<vmem>>, vector<1x128xf32>
    %cst_10 = arith.constant dense<0.000000e+00> : vector<200x128xf32>
    %10 = tpu.matmul %7, %8, %cst_10 {dimension_numbers = #tpu.dot_dimension_numbers<[1], [0], [0], [1], [0, 0, 1, 1], [], []>} : vector<200x128xf32>, vector<128x128xf32>, vector<200x128xf32> -> vector<200x128xf32>
    %11 = vector.broadcast %9 : vector<1x128xf32> to vector<200x128xf32>
    %12 = arith.addf %10, %11 : vector<200x128xf32>
    %cst_11 = arith.constant 0.000000e+00 : f32
    %13 = vector.broadcast %cst_11 : f32 to vector<200x128xf32>
    %14 = arith.maximumf %12, %13 : vector<200x128xf32>
    %c0_12 = arith.constant 0 : index
    %c0_13 = arith.constant 0 : index
    %15 = vector.load %arg6[%c0_12, %c0_13] : memref<128x256xf32, #tpu.memory_space<vmem>>, vector<128x256xf32>
    %c0_14 = arith.constant 0 : index
    %c0_15 = arith.constant 0 : index
    %16 = vector.load %arg7[%c0_14, %c0_15] : memref<1x256xf32, #tpu.memory_space<vmem>>, vector<1x256xf32>
    %cst_16 = arith.constant dense<0.000000e+00> : vector<200x256xf32>
    %17 = tpu.matmul %14, %15, %cst_16 {dimension_numbers = #tpu.dot_dimension_numbers<[1], [0], [0], [1], [0, 0, 1, 1], [], []>} : vector<200x128xf32>, vector<128x256xf32>, vector<200x256xf32> -> vector<200x256xf32>
    %18 = vector.broadcast %16 : vector<1x256xf32> to vector<200x256xf32>
    %19 = arith.addf %17, %18 : vector<200x256xf32>
    %20 = vector.extract_strided_slice %19 {offsets = [0, 0], sizes = [200, 128], strides = [1, 1]} : vector<200x256xf32> to vector<200x128xf32>
    %21 = vector.extract_strided_slice %19 {offsets = [0, 128], sizes = [200, 128], strides = [1, 1]} : vector<200x256xf32> to vector<200x128xf32>
    %c0_17 = arith.constant 0 : index
    %c0_18 = arith.constant 0 : index
    %22 = vector.load %arg8[%c0_17, %c0_18] : memref<200x128xf32, #tpu.memory_space<vmem>>, vector<200x128xf32>
    tpu.vector_store %arg8[%c0_17, %c0_18], %20 {strides = array<i32>} : memref<200x128xf32, #tpu.memory_space<vmem>>, vector<200x128xf32>,
    %c0_19 = arith.constant 0 : index
    %c0_20 = arith.constant 0 : index
    %23 = vector.load %arg10[%c0_19, %c0_20] : memref<200x128xf32, #tpu.memory_space<vmem>>, vector<200x128xf32>
    tpu.vector_store %arg10[%c0_19, %c0_20], %21 {strides = array<i32>} : memref<200x128xf32, #tpu.memory_space<vmem>>, vector<200x128xf32>,
    %cst_21 = arith.constant 5.000000e-01 : f32
    %24 = vector.broadcast %cst_21 : f32 to vector<200x128xf32>
    %25 = arith.mulf %24, %21 : vector<200x128xf32>
    %26 = math.exp %25 : vector<200x128xf32>
    %c0_22 = arith.constant 0 : index
    %c0_23 = arith.constant 0 : index
    %27 = vector.load %arg9[%c0_22, %c0_23] : memref<200x128xf32, #tpu.memory_space<vmem>>, vector<200x128xf32>
    tpu.vector_store %arg9[%c0_22, %c0_23], %26 {strides = array<i32>} : memref<200x128xf32, #tpu.memory_space<vmem>>, vector<200x128xf32>,
    return
  }
  func.func @transform_0(%arg0: i32) -> (i32, i32) {
    %c0_i32 = arith.constant 0 : i32
    %c0_i32_0 = arith.constant 0 : i32
    return %arg0, %c0_i32 : i32, i32
  }
  func.func @transform_1(%arg0: i32) -> (i32, i32) {
    %c0_i32 = arith.constant 0 : i32
    %c0_i32_0 = arith.constant 0 : i32
    %c0_i32_1 = arith.constant 0 : i32
    return %c0_i32, %c0_i32_0 : i32, i32
  }
  func.func @transform_2(%arg0: i32) -> (i32, i32) {
    %c0_i32 = arith.constant 0 : i32
    %c0_i32_0 = arith.constant 0 : i32
    %c0_i32_1 = arith.constant 0 : i32
    return %c0_i32, %c0_i32_0 : i32, i32
  }
  func.func @transform_3(%arg0: i32) -> (i32, i32) {
    %c0_i32 = arith.constant 0 : i32
    %c0_i32_0 = arith.constant 0 : i32
    %c0_i32_1 = arith.constant 0 : i32
    return %c0_i32, %c0_i32_0 : i32, i32
  }
  func.func @transform_4(%arg0: i32) -> (i32, i32) {
    %c0_i32 = arith.constant 0 : i32
    %c0_i32_0 = arith.constant 0 : i32
    %c0_i32_1 = arith.constant 0 : i32
    return %c0_i32, %c0_i32_0 : i32, i32
  }
  func.func @transform_5(%arg0: i32) -> (i32, i32) {
    %c0_i32 = arith.constant 0 : i32
    %c0_i32_0 = arith.constant 0 : i32
    %c0_i32_1 = arith.constant 0 : i32
    return %c0_i32, %c0_i32_0 : i32, i32
  }
  func.func @transform_6(%arg0: i32) -> (i32, i32) {
    %c0_i32 = arith.constant 0 : i32
    %c0_i32_0 = arith.constant 0 : i32
    %c0_i32_1 = arith.constant 0 : i32
    return %c0_i32, %c0_i32_0 : i32, i32
  }
  func.func @transform_7(%arg0: i32) -> (i32, i32) {
    %c0_i32 = arith.constant 0 : i32
    %c0_i32_0 = arith.constant 0 : i32
    return %arg0, %c0_i32 : i32, i32
  }
  func.func @transform_8(%arg0: i32) -> (i32, i32) {
    %c0_i32 = arith.constant 0 : i32
    %c0_i32_0 = arith.constant 0 : i32
    return %arg0, %c0_i32 : i32, i32
  }
  func.func @transform_9(%arg0: i32) -> (i32, i32) {
    %c0_i32 = arith.constant 0 : i32
    %c0_i32_0 = arith.constant 0 : i32
    return %arg0, %c0_i32 : i32, i32
  }
}

</mosaic_0001>

<bundles_post_ra>
// kernel: encoder_forward.1
= control target key start
LH: loop header
LB: loop body
LE: loop exit
PB: predicated region body
PF: predicated region fallthrough
CT: control target
= control target key end

     0   :  { %v1333_v0 = vmov 0.0   ;;  %vm1334_vm0 = vmmov 0   ;;  %s2197_s1 = inlined_call_operand.vmem [shape: f32[128,128], index: 1, kind: input, shape index: {}]   ;;  %s2198_s0 = inlined_call_operand.vmem [shape: f32[200,128], index: 0, kind: input, shape index: {}]   ;;  %s2199_s3 = inlined_call_operand.vmem [shape: f32[128,128], index: 3, kind: input, shape index: {}]   ;;  %s2200_s5 = inlined_call_operand.vmem [shape: f32[128,256], index: 5, kind: input, shape index: {}]   ;;  %s2201_s2 = inlined_call_operand.vmem [shape: f32[1,128], index: 2, kind: input, shape index: {}]   ;;  %s2202_s4 = inlined_call_operand.vmem [shape: f32[1,128], index: 4, kind: input, shape index: {}]   ;;  %s2203_s6 = inlined_call_operand.vmem [shape: f32[1,256], index: 6, kind: input, shape index: {}]   ;;  %s2204_s7 = inlined_call_operand.vmem [shape: f32[200,128], index: 7, kind: output, shape index: {0}]   ;;  %s2205_s9 = inlined_call_operand.vmem [shape: f32[200,128], index: 9, kind: output, shape index: {2}]   ;;  %s2206_s8 = inlined_call_operand.vmem [shape: f32[200,128], index: 8, kind: output, shape index: {1}]  }
   0x1   :  { %1035 = vmatprep.subr.mxu0 %v1333_v0  ;;  %v69_v1 = vld [vmem:[%s2197_s1 + $0x78] sm:$0xff]  ;;  %v68_v2 = vld [vmem:[%s2197_s1 + $0x70] sm:$0xff]  ;;  %1067 = vmatprep.mubr.msk.f32.mxu0 %vm1334_vm0, %v1333_v0  ;;  %v67_v3 = vld [vmem:[%s2197_s1 + $0x68] sm:$0xff] }
   0x2   :  { %1036 = vmatpush3.msra.mxu0 %v69_v1  ;;  %1249 = vmatprep.subr.mxu1 %v1333_v0  ;;  %v66_v4 = vld [vmem:[%s2197_s1 + $0x60] sm:$0xff]  ;;  %v65_v5 = vld [vmem:[%s2197_s1 + $0x58] sm:$0xff]  ;;  %v64_v6 = vld [vmem:[%s2197_s1 + $0x50] sm:$0xff] }
   0x3   :  { %1037 = vmatprep.subr.mxu0 %v1333_v0  ;;  %1265 = vmatpush3.msra.mxu1 %v69_v1  ;;  %v63_v7 = vld [vmem:[%s2197_s1 + $0x48] sm:$0xff]  ;;  %v62_v8 = vld [vmem:[%s2197_s1 + $0x40] sm:$0xff]  ;;  %v61_v9 = vld [vmem:[%s2197_s1 + $0x38] sm:$0xff] }
   0x4   :  { %1038 = vmatpush3.msra.mxu0 %v68_v2  ;;  %1250 = vmatprep.subr.mxu1 %v1333_v0  ;;  %v60_v10 = vld [vmem:[%s2197_s1 + $0x30] sm:$0xff]  ;;  %v59_v11 = vld [vmem:[%s2197_s1 + $0x28] sm:$0xff]  ;;  %v58_v12 = vld [vmem:[%s2197_s1 + $0x20] sm:$0xff] }
   0x5   :  { %1039 = vmatprep.subr.mxu0 %v1333_v0  ;;  %1266 = vmatpush3.msra.mxu1 %v68_v2  ;;  %v57_v13 = vld [vmem:[%s2197_s1 + $0x18] sm:$0xff]  ;;  %v56_v14 = vld [vmem:[%s2197_s1 + $0x10] sm:$0xff]  ;;  %v55_v15 = vld [vmem:[%s2197_s1 + $0x8] sm:$0xff] }
   0x6   :  { %1040 = vmatpush3.msra.mxu0 %v67_v3  ;;  %1251 = vmatprep.subr.mxu1 %v1333_v0  ;;  %v54_v16 = vld [vmem:[%s2197_s1] sm:$0xff]  ;;  %v42_v18 = vld [vmem:[%s2198_s0 + $0x68] sm:$0xff]  ;;  %v307_v19 = vld [vmem:[%s2199_s3 + $0x78] sm:$0xff] }
   0x7   :  { %1041 = vmatprep.subr.mxu0 %v1333_v0  ;;  %1267 = vmatpush3.msra.mxu1 %v67_v3  ;;  %v29_v17 = vld [vmem:[%s2198_s0] sm:$0xff]  ;;  %v30_v20 = vld [vmem:[%s2198_s0 + $0x8] sm:$0xff]  ;;  %v306_v21 = vld [vmem:[%s2199_s3 + $0x70] sm:$0xff] }
   0x8   :  { %1042 = vmatpush3.msra.mxu0 %v66_v4  ;;  %1252 = vmatprep.subr.mxu1 %v1333_v0  ;;  %v43_v22 = vld [vmem:[%s2198_s0 + $0x70] sm:$0xff]  ;;  %v305_v23 = vld [vmem:[%s2199_s3 + $0x68] sm:$0xff]  ;;  %v304_v25 = vld [vmem:[%s2199_s3 + $0x60] sm:$0xff] }
   0x9   :  { %1043 = vmatprep.subr.mxu0 %v1333_v0  ;;  %1268 = vmatpush3.msra.mxu1 %v66_v4  ;;  %v31_v24 = vld [vmem:[%s2198_s0 + $0x10] sm:$0xff]  ;;  %v44_v26 = vld [vmem:[%s2198_s0 + $0x78] sm:$0xff]  ;;  %v45_v30 = vld [vmem:[%s2198_s0 + $0x80] sm:$0xff] }
   0xa   :  { %1044 = vmatpush3.msra.mxu0 %v65_v5  ;;  %1253 = vmatprep.subr.mxu1 %v1333_v0  ;;  %v303_v27 = vld [vmem:[%s2199_s3 + $0x58] sm:$0xff]  ;;  %v302_v29 = vld [vmem:[%s2199_s3 + $0x50] sm:$0xff]  ;;  %v301_v31 = vld [vmem:[%s2199_s3 + $0x48] sm:$0xff] }
   0xb   :  { %1045 = vmatprep.subr.mxu0 %v1333_v0  ;;  %1269 = vmatpush3.msra.mxu1 %v65_v5  ;;  %v32_v28 = vld [vmem:[%s2198_s0 + $0x18] sm:$0xff]  ;;  %v33_v32 = vld [vmem:[%s2198_s0 + $0x20] sm:$0xff]  ;;  %v46_v34 = vld [vmem:[%s2198_s0 + $0x88] sm:$0xff] }
   0xc   :  { %1046 = vmatpush3.msra.mxu0 %v64_v6  ;;  %1254 = vmatprep.subr.mxu1 %v1333_v0  ;;  %v300_v33 = vld [vmem:[%s2199_s3 + $0x40] sm:$0xff]  ;;  %v299_v35 = vld [vmem:[%s2199_s3 + $0x38] sm:$0xff]  ;;  %v34_v36 = vld [vmem:[%s2198_s0 + $0x28] sm:$0xff] }
   0xd   :  { %1047 = vmatprep.subr.mxu0 %v1333_v0  ;;  %1270 = vmatpush3.msra.mxu1 %v64_v6  ;;  %v298_v37 = vld [vmem:[%s2199_s3 + $0x30] sm:$0xff]  ;;  %v297_v39 = vld [vmem:[%s2199_s3 + $0x28] sm:$0xff]  ;;  %v296_v41 = vld [vmem:[%s2199_s3 + $0x20] sm:$0xff] }
   0xe   :  { %1048 = vmatpush3.msra.mxu0 %v63_v7  ;;  %1255 = vmatprep.subr.mxu1 %v1333_v0  ;;  %v47_v38 = vld [vmem:[%s2198_s0 + $0x90] sm:$0xff]  ;;  %v48_v42 = vld [vmem:[%s2198_s0 + $0x98] sm:$0xff]  ;;  %v49_v46 = vld [vmem:[%s2198_s0 + $0xa0] sm:$0xff] }
   0xf   :  { %1049 = vmatprep.subr.mxu0 %v1333_v0  ;;  %1271 = vmatpush3.msra.mxu1 %v63_v7  ;;  %v35_v40 = vld [vmem:[%s2198_s0 + $0x30] sm:$0xff]  ;;  %v295_v43 = vld [vmem:[%s2199_s3 + $0x18] sm:$0xff]  ;;  %v293_v47 = vld [vmem:[%s2199_s3 + $0x8] sm:$0xff] }
  0x10   :  { %1050 = vmatpush3.msra.mxu0 %v62_v8  ;;  %1256 = vmatprep.subr.mxu1 %v1333_v0  ;;  %v36_v44 = vld [vmem:[%s2198_s0 + $0x38] sm:$0xff]  ;;  %v294_v45 = vld [vmem:[%s2199_s3 + $0x10] sm:$0xff]  ;;  %v37_v48 = vld [vmem:[%s2198_s0 + $0x40] sm:$0xff] }
  0x11   :  { %1051 = vmatprep.subr.mxu0 %v1333_v0  ;;  %1272 = vmatpush3.msra.mxu1 %v62_v8  ;;  %v50_v49 = vld [vmem:[%s2198_s0 + $0xa8] sm:$0xff]  ;;  %v51_v51 = vld [vmem:[%s2198_s0 + $0xb0] sm:$0xff]  ;;  %v52_v53 = vld [vmem:[%s2198_s0 + $0xb8] sm:$0xff] }
  0x12   :  { %1052 = vmatpush3.msra.mxu0 %v61_v9  ;;  %1257 = vmatprep.subr.mxu1 %v1333_v0  ;;  %v38_v50 = vld [vmem:[%s2198_s0 + $0x48] sm:$0xff]  ;;  %v39_v52 = vld [vmem:[%s2198_s0 + $0x50] sm:$0xff]  ;;  %v40_v54 = vld [vmem:[%s2198_s0 + $0x58] sm:$0xff] }
  0x13   :  { %1053 = vmatprep.subr.mxu0 %v1333_v0  ;;  %1273 = vmatpush3.msra.mxu1 %v61_v9  ;;  %v53_v55 = vld [vmem:[%s2198_s0 + $0xc0] sm:$0xff]  ;;  %v561_v58 = vld [vmem:[%s2200_s5 + $0xf8] sm:$0xff]  ;;  %v560_v59 = vld [vmem:[%s2200_s5 + $0xf0] sm:$0xff] }
  0x14   :  { %1054 = vmatpush3.msra.mxu0 %v60_v10  ;;  %1258 = vmatprep.subr.mxu1 %v1333_v0  ;;  %v41_v56 = vld [vmem:[%s2198_s0 + $0x60] sm:$0xff]  ;;  %v559_v60 = vld [vmem:[%s2200_s5 + $0xe8] sm:$0xff]  ;;  %v557_v62 = vld [vmem:[%s2200_s5 + $0xd8] sm:$0xff] }
  0x15   :  { %1055 = vmatprep.subr.mxu0 %v1333_v0  ;;  %1274 = vmatpush3.msra.mxu1 %v60_v10  ;;  %v292_v57 = vld [vmem:[%s2199_s3] sm:$0xff]  ;;  %v556_v63 = vld [vmem:[%s2200_s5 + $0xd0] sm:$0xff]  ;;  %v555_v1 = vld [vmem:[%s2200_s5 + $0xc8] sm:$0xff] }
  0x16   :  { %1056 = vmatpush3.msra.mxu0 %v59_v11  ;;  %1259 = vmatprep.subr.mxu1 %v1333_v0  ;;  %v558_v61 = vld [vmem:[%s2200_s5 + $0xe0] sm:$0xff]  ;;  %v553_v3 = vld [vmem:[%s2200_s5 + $0xb8] sm:$0xff]  ;;  %v552_v4 = vld [vmem:[%s2200_s5 + $0xb0] sm:$0xff] }
  0x17   :  { %1057 = vmatprep.subr.mxu0 %v1333_v0  ;;  %1275 = vmatpush3.msra.mxu1 %v59_v11  ;;  %v554_v2 = vld [vmem:[%s2200_s5 + $0xc0] sm:$0xff]  ;;  %v551_v5 = vld [vmem:[%s2200_s5 + $0xa8] sm:$0xff]  ;;  %v549_v7 = vld [vmem:[%s2200_s5 + $0x98] sm:$0xff] }
  0x18   :  { %1058 = vmatpush3.msra.mxu0 %v58_v12  ;;  %1260 = vmatprep.subr.mxu1 %v1333_v0  ;;  %v550_v6 = vld [vmem:[%s2200_s5 + $0xa0] sm:$0xff]  ;;  %v548_v8 = vld [vmem:[%s2200_s5 + $0x90] sm:$0xff]  ;;  %v547_v9 = vld [vmem:[%s2200_s5 + $0x88] sm:$0xff] }
  0x19   :  { %1059 = vmatprep.subr.mxu0 %v1333_v0  ;;  %1276 = vmatpush3.msra.mxu1 %v58_v12  ;;  %v546_v10 = vld [vmem:[%s2200_s5 + $0x80] sm:$0xff]  ;;  %v545_v11 = vld [vmem:[%s2200_s5 + $0x78] sm:$0xff]  ;;  %v544_v12 = vld [vmem:[%s2200_s5 + $0x70] sm:$0xff] }
  0x1a   :  { %1060 = vmatpush3.msra.mxu0 %v57_v13  ;;  %1261 = vmatprep.subr.mxu1 %v1333_v0 }
  0x1b   :  { %1061 = vmatprep.subr.mxu0 %v1333_v0  ;;  %1277 = vmatpush3.msra.mxu1 %v57_v13  ;;  %v543_v13 = vld [vmem:[%s2200_s5 + $0x68] sm:$0xff] }
  0x1c   :  { %1062 = vmatpush3.msra.mxu0 %v56_v14  ;;  %1262 = vmatprep.subr.mxu1 %v1333_v0 }
  0x1d   :  { %1063 = vmatprep.subr.mxu0 %v1333_v0  ;;  %1278 = vmatpush3.msra.mxu1 %v56_v14  ;;  %v542_v14 = vld [vmem:[%s2200_s5 + $0x60] sm:$0xff] }
  0x1e   :  { %1064 = vmatpush3.msra.mxu0 %v55_v15  ;;  %1263 = vmatprep.subr.mxu1 %v1333_v0 }
  0x1f   :  { %1065 = vmatprep.subr.mxu0 %v1333_v0  ;;  %1279 = vmatpush3.msra.mxu1 %v55_v15  ;;  %v541_v15 = vld [vmem:[%s2200_s5 + $0x58] sm:$0xff] }
  0x20   :  { %1066 = vmatpush3.msra.mxu0 %v54_v16  ;;  %1264 = vmatprep.subr.mxu1 %v1333_v0 }
  0x21   :  { %1068 = vmatmul.mubr.f32.vlgmr.msra.gmra.mxu0 %v29_v17  ;;  %1280 = vmatpush3.msra.mxu1 %v54_v16  ;;  %v540_v16 = vld [vmem:[%s2200_s5 + $0x50] sm:$0xff]  ;;  %v539_v17 = vld [vmem:[%s2200_s5 + $0x48] sm:$0xff] }
  0x22   :  { %1070 = vmatprep.mubr.msk.f32.mxu0 %vm1334_vm0, %v1333_v0  ;;  %1106 = vmatprep.mubr.msk.f32.mxu1 %vm1334_vm0, %v1333_v0 }
  0x23   :  { %1107 = vmatmul.mubr.f32.vlgmr.msra.gmra.mxu1 %v42_v18  ;;  %1142 = vmatprep.subr.mxu1 %v1333_v0  ;;  %v538_v18 = vld [vmem:[%s2200_s5 + $0x40] sm:$0xff] }
  0x24   :  { %1109 = vmatprep.mubr.msk.f32.mxu1 %vm1334_vm0, %v1333_v0  ;;  %1143 = vmatpush3.msra.mxu1 %v307_v19  ;;  %v537_v19 = vld [vmem:[%s2200_s5 + $0x38] sm:$0xff] }
  0x25   :  { %1071 = vmatmul.mubr.f32.gmra.mxu0 %v30_v20  ;;  %1144 = vmatprep.subr.mxu1 %v1333_v0  ;;  %v536_v20 = vld [vmem:[%s2200_s5 + $0x30] sm:$0xff] }
  0x26   :  { %1073 = vmatprep.mubr.msk.f32.mxu0 %vm1334_vm0, %v1333_v0  ;;  %1145 = vmatpush3.msra.mxu1 %v306_v21  ;;  %v1738_v21 = vld [vmem:[%s2201_s2] ss:$0 sm:$0xff] }
  0x27   :  { %1110 = vmatmul.mubr.f32.gmra.mxu1 %v43_v22  ;;  %1146 = vmatprep.subr.mxu1 %v1333_v0  ;;  %v535_v22 = vld [vmem:[%s2200_s5 + $0x28] sm:$0xff] }
  0x28   :  { %1112 = vmatprep.mubr.msk.f32.mxu1 %vm1334_vm0, %v1333_v0  ;;  %1147 = vmatpush3.msra.mxu1 %v305_v23  ;;  %v534_v23 = vld [vmem:[%s2200_s5 + $0x20] sm:$0xff] }
  0x29   :  { %1074 = vmatmul.mubr.f32.gmra.mxu0 %v31_v24  ;;  %1148 = vmatprep.subr.mxu1 %v1333_v0 }
  0x2a   :  { %1076 = vmatprep.mubr.msk.f32.mxu0 %vm1334_vm0, %v1333_v0  ;;  %1149 = vmatpush3.msra.mxu1 %v304_v25  ;;  %v533_v25 = vld [vmem:[%s2200_s5 + $0x18] sm:$0xff] }
  0x2b   :  { %1113 = vmatmul.mubr.f32.gmra.mxu1 %v44_v26  ;;  %1150 = vmatprep.subr.mxu1 %v1333_v0 }
  0x2c   :  { %1115 = vmatprep.mubr.msk.f32.mxu1 %vm1334_vm0, %v1333_v0  ;;  %1151 = vmatpush3.msra.mxu1 %v303_v27  ;;  %v532_v27 = vld [vmem:[%s2200_s5 + $0x10] sm:$0xff] }
  0x2d   :  { %1077 = vmatmul.mubr.f32.gmra.mxu0 %v32_v28  ;;  %1152 = vmatprep.subr.mxu1 %v1333_v0 }
  0x2e   :  { %1079 = vmatprep.mubr.msk.f32.mxu0 %vm1334_vm0, %v1333_v0  ;;  %1153 = vmatpush3.msra.mxu1 %v302_v29 }
  0x2f   :  { %1116 = vmatmul.mubr.f32.gmra.mxu1 %v45_v30  ;;  %1154 = vmatprep.subr.mxu1 %v1333_v0 }
  0x30   :  { %1118 = vmatprep.mubr.msk.f32.mxu1 %vm1334_vm0, %v1333_v0  ;;  %1155 = vmatpush3.msra.mxu1 %v301_v31 }
  0x31   :  { %1080 = vmatmul.mubr.f32.gmra.mxu0 %v33_v32  ;;  %1156 = vmatprep.subr.mxu1 %v1333_v0 }
  0x32   :  { %1082 = vmatprep.mubr.msk.f32.mxu0 %vm1334_vm0, %v1333_v0  ;;  %1157 = vmatpush3.msra.mxu1 %v300_v33 }
  0x33   :  { %1119 = vmatmul.mubr.f32.gmra.mxu1 %v46_v34  ;;  %1158 = vmatprep.subr.mxu1 %v1333_v0 }
  0x34   :  { %1121 = vmatprep.mubr.msk.f32.mxu1 %vm1334_vm0, %v1333_v0  ;;  %1159 = vmatpush3.msra.mxu1 %v299_v35 }
  0x35   :  { %1083 = vmatmul.mubr.f32.gmra.mxu0 %v34_v36  ;;  %1160 = vmatprep.subr.mxu1 %v1333_v0 }
  0x36   :  { %1085 = vmatprep.mubr.msk.f32.mxu0 %vm1334_vm0, %v1333_v0  ;;  %1161 = vmatpush3.msra.mxu1 %v298_v37 }
  0x37   :  { %1122 = vmatmul.mubr.f32.gmra.mxu1 %v47_v38  ;;  %1162 = vmatprep.subr.mxu1 %v1333_v0 }
  0x38   :  { %1124 = vmatprep.mubr.msk.f32.mxu1 %vm1334_vm0, %v1333_v0  ;;  %1163 = vmatpush3.msra.mxu1 %v297_v39 }
  0x39   :  { %1086 = vmatmul.mubr.f32.gmra.mxu0 %v35_v40  ;;  %1164 = vmatprep.subr.mxu1 %v1333_v0 }
  0x3a   :  { %1088 = vmatprep.mubr.msk.f32.mxu0 %vm1334_vm0, %v1333_v0  ;;  %1165 = vmatpush3.msra.mxu1 %v296_v41 }
  0x3b   :  { %1125 = vmatmul.mubr.f32.gmra.mxu1 %v48_v42  ;;  %1166 = vmatprep.subr.mxu1 %v1333_v0 }
  0x3c   :  { %1127 = vmatprep.mubr.msk.f32.mxu1 %vm1334_vm0, %v1333_v0  ;;  %1167 = vmatpush3.msra.mxu1 %v295_v43 }
  0x3d   :  { %1089 = vmatmul.mubr.f32.gmra.mxu0 %v36_v44  ;;  %1168 = vmatprep.subr.mxu1 %v1333_v0 }
  0x3e   :  { %1091 = vmatprep.mubr.msk.f32.mxu0 %vm1334_vm0, %v1333_v0  ;;  %1169 = vmatpush3.msra.mxu1 %v294_v45 }
  0x3f   :  { %1128 = vmatmul.mubr.f32.gmra.mxu1 %v49_v46  ;;  %1170 = vmatprep.subr.mxu1 %v1333_v0 }
  0x40   :  { %1130 = vmatprep.mubr.msk.f32.mxu1 %vm1334_vm0, %v1333_v0  ;;  %1171 = vmatpush3.msra.mxu1 %v293_v47 }
  0x41   :  { %1092 = vmatmul.mubr.f32.gmra.mxu0 %v37_v48  ;;  %1172 = vmatprep.subr.mxu1 %v1333_v0 }
  0x42   :  { %1094 = vmatprep.mubr.msk.f32.mxu0 %vm1334_vm0, %v1333_v0  ;;  %1173 = vmatpush3.msra.mxu1 %v292_v57 }
  0x43   :  { %1131 = vmatmul.mubr.f32.gmra.mxu1 %v50_v49  ;;  %574 = vmatprep.subr.mxu0 %v561_v58 }
  0x44   :  { %1133 = vmatprep.mubr.msk.f32.mxu1 %vm1334_vm0, %v1333_v0  ;;  %575 = vmatpush1.msra.mxu0 %v560_v59 }
  0x45   :  { %1095 = vmatmul.mubr.f32.gmra.mxu0 %v38_v50  ;;  %576 = vmatprep.subr.mxu0 %v559_v60 }
  0x46   :  { %1097 = vmatprep.mubr.msk.f32.mxu0 %vm1334_vm0, %v1333_v0  ;;  %577 = vmatpush1.msra.mxu0 %v558_v61 }
  0x47   :  { %1134 = vmatmul.mubr.f32.gmra.mxu1 %v51_v51  ;;  %578 = vmatprep.subr.mxu0 %v557_v62 }
  0x48   :  { %1136 = vmatprep.mubr.msk.f32.mxu1 %vm1334_vm0, %v1333_v0  ;;  %579 = vmatpush1.msra.mxu0 %v556_v63 }
  0x49   :  { %1098 = vmatmul.mubr.f32.gmra.mxu0 %v39_v52  ;;  %580 = vmatprep.subr.mxu0 %v555_v1 }
  0x4a   :  { %1100 = vmatprep.mubr.msk.f32.mxu0 %vm1334_vm0, %v1333_v0  ;;  %581 = vmatpush1.msra.mxu0 %v554_v2 }
  0x4b   :  { %1137 = vmatmul.mubr.f32.gmra.mxu1 %v52_v53  ;;  %582 = vmatprep.subr.mxu0 %v553_v3 }
  0x4c   :  { %1139 = vmatprep.mubr.msk.f32.mxu1 %vm1334_vm0, %v1333_v0  ;;  %583 = vmatpush1.msra.mxu0 %v552_v4 }
  0x4d   :  { %1101 = vmatmul.mubr.f32.gmra.mxu0 %v40_v54  ;;  %584 = vmatprep.subr.mxu0 %v551_v5 }
  0x4e   :  { %1103 = vmatprep.mubr.msk.f32.mxu0 %vm1334_vm0, %v1333_v0  ;;  %585 = vmatpush1.msra.mxu0 %v550_v6 }
  0x4f   :  { %1140 = vmatmul.mubr.f32.gmra.mxu1 %v53_v55  ;;  %586 = vmatprep.subr.mxu0 %v549_v7 }
  0x50   :  { %1174 = vmatprep.mubr.msk.f32.mxu1 %vm1334_vm0, %v1333_v0  ;;  %587 = vmatpush1.msra.mxu0 %v548_v8 }
  0x51   :  { %1104 = vmatmul.mubr.f32.gmra.mxu0 %v41_v56  ;;  %588 = vmatprep.subr.mxu0 %v547_v9 }
  0x52   :  { %638 = vmatprep.mubr.f32.mxu0 %v1333_v0  ;;  %589 = vmatpush1.msra.mxu0 %v546_v10 }
  0x53   :  { %590 = vmatprep.subr.mxu0 %v545_v11 }
  0x54   :  { %591 = vmatpush1.msra.mxu0 %v544_v12 }
  0x55   :  { %592 = vmatprep.subr.mxu0 %v543_v13 }
  0x56   :  { %593 = vmatpush1.msra.mxu0 %v542_v14 }
  0x57   :  { %594 = vmatprep.subr.mxu0 %v541_v15 }
  0x58   :  { %595 = vmatpush1.msra.mxu0 %v540_v16 }
  0x59   :  { %596 = vmatprep.subr.mxu0 %v539_v17 }
  0x5a   :  { %597 = vmatpush1.msra.mxu0 %v538_v18 }
  0x5b   :  { %598 = vmatprep.subr.mxu0 %v537_v19 }
  0x5c   :  { %599 = vmatpush1.msra.mxu0 %v536_v20 }
  0x5d   :  { %600 = vmatprep.subr.mxu0 %v535_v22 }
  0x5e   :  { %601 = vmatpush1.msra.mxu0 %v534_v23 }
  0x5f   :  { %602 = vmatprep.subr.mxu0 %v533_v25 }
  0x60   :  { %603 = vmatpush1.msra.mxu0 %v532_v27 }
  0xe1   :  { %v143_v24 = vpop.f32.mrf.mxu0 }
  0xe2   :  { %v144_v26 = vadd.f32 %v1738_v21, %v143_v24 }
  0xe3   :  { %v1069_v28 = vpop.f32.mrf.mxu0  ;;  %v1753_v29 = vpop.f32.mrf.mxu1 }
  0xe4   :  { %v267_v30 = vmax.f32 %v144_v26, 0.0 }
  0xe5   :  { %v148_v31 = vpop.f32.mrf.mxu0  ;;  %v1108_v32 = vpop.f32.mrf.mxu1 }
  0xe6   :  { %v149_v33 = vadd.f32 %v1738_v21, %v148_v31  ;;  %1175 = vmatmul.mubr.f32.vlgmr.msra.gmra.mxu1 %v267_v30 }
  0xe7   :  { %v1072_v34 = vpop.f32.mrf.mxu0  ;;  %1177 = vmatprep.mubr.msk.f32.mxu1 %vm1334_vm0, %v1333_v0  ;;  %v1758_v35 = vpop.f32.mrf.mxu1 }
  0xe8   :  { %v268_v36 = vmax.f32 %v149_v33, 0.0 }
  0xe9   :  { %v153_v37 = vpop.f32.mrf.mxu0  ;;  %v1111_v38 = vpop.f32.mrf.mxu1 }
  0xea   :  { %v154_v39 = vadd.f32 %v1738_v21, %v153_v37  ;;  %1178 = vmatmul.mubr.f32.gmra.mxu1 %v268_v36 }
  0xeb   :  { %v1075_v40 = vpop.f32.mrf.mxu0  ;;  %1180 = vmatprep.mubr.msk.f32.mxu1 %vm1334_vm0, %v1333_v0  ;;  %v1763_v41 = vpop.f32.mrf.mxu1 }
  0xec   :  { %v269_v42 = vmax.f32 %v154_v39, 0.0  ;;  %v209_v40 = vadd.f32 %v1738_v21, %v1753_v29 }
  0xed   :  { %v158_v43 = vpop.f32.mrf.mxu0  ;;  %v1114_v44 = vpop.f32.mrf.mxu1 }
  0xee   :  { %v159_v45 = vadd.f32 %v1738_v21, %v158_v43  ;;  %1181 = vmatmul.mubr.f32.gmra.mxu1 %v269_v42  ;;  %v280_v44 = vmax.f32 %v209_v40, 0.0 }
  0xef   :  { %v1078_v46 = vpop.f32.mrf.mxu0  ;;  %1183 = vmatprep.mubr.msk.f32.mxu1 %vm1334_vm0, %v1333_v0  ;;  %v1768_v47 = vpop.f32.mrf.mxu1 }
  0xf0   :  { %v270_v48 = vmax.f32 %v159_v45, 0.0  ;;  %v214_v45 = vadd.f32 %v1738_v21, %v1758_v35 }
  0xf1   :  { %v163_v49 = vpop.f32.mrf.mxu0  ;;  %v1117_v50 = vpop.f32.mrf.mxu1 }
  0xf2   :  { %v164_v51 = vadd.f32 %v1738_v21, %v163_v49  ;;  %1184 = vmatmul.mubr.f32.gmra.mxu1 %v270_v48  ;;  %v281_v46 = vmax.f32 %v214_v45, 0.0  ;;  %v219_v48 = vadd.f32 %v1738_v21, %v1763_v41  ;;  %v224_v49 = vadd.f32 %v1738_v21, %v1768_v47  ;;  %v531_v47 = vld [vmem:[%s2200_s5 + $0x8] sm:$0xff] }
  0xf3   :  { %v1081_v52 = vpop.f32.mrf.mxu0  ;;  %1186 = vmatprep.mubr.msk.f32.mxu1 %vm1334_vm0, %v1333_v0  ;;  %v1773_v53 = vpop.f32.mrf.mxu1  ;;  %604 = vmatprep.subr.mxu0 %v531_v47 }
  0xf4   :  { %v271_v54 = vmax.f32 %v164_v51, 0.0  ;;  %v282_v29 = vmax.f32 %v219_v48, 0.0  ;;  %v283_v35 = vmax.f32 %v224_v49, 0.0  ;;  %v229_v50 = vadd.f32 %v1738_v21, %v1773_v53  ;;  %v530_v52 = vld [vmem:[%s2200_s5] sm:$0xff] }
  0xf5   :  { %v168_v55 = vpop.f32.mrf.mxu0  ;;  %v1120_v56 = vpop.f32.mrf.mxu1  ;;  %605 = vmatpush1.msra.mxu0 %v530_v52 }
  0xf6   :  { %v169_v57 = vadd.f32 %v1738_v21, %v168_v55  ;;  %1187 = vmatmul.mubr.f32.gmra.mxu1 %v271_v54  ;;  %v284_v41 = vmax.f32 %v229_v50, 0.0 }
  0xf7   :  { %v1084_v58 = vpop.f32.mrf.mxu0  ;;  %1189 = vmatprep.mubr.msk.f32.mxu1 %vm1334_vm0, %v1333_v0  ;;  %v1778_v59 = vpop.f32.mrf.mxu1 }
  0xf8   :  { %v272_v60 = vmax.f32 %v169_v57, 0.0  ;;  %v234_v51 = vadd.f32 %v1738_v21, %v1778_v59 }
  0xf9   :  { %v173_v61 = vpop.f32.mrf.mxu0  ;;  %v1123_v62 = vpop.f32.mrf.mxu1 }
  0xfa   :  { %v174_v63 = vadd.f32 %v1738_v21, %v173_v61  ;;  %1190 = vmatmul.mubr.f32.gmra.mxu1 %v272_v60  ;;  %v285_v53 = vmax.f32 %v234_v51, 0.0 }
  0xfb   :  { %v1087_v1 = vpop.f32.mrf.mxu0  ;;  %1192 = vmatprep.mubr.msk.f32.mxu1 %vm1334_vm0, %v1333_v0  ;;  %v1783_v2 = vpop.f32.mrf.mxu1 }
  0xfc   :  { %v273_v3 = vmax.f32 %v174_v63, 0.0  ;;  %v239_v54 = vadd.f32 %v1738_v21, %v1783_v2 }
  0xfd   :  { %v178_v4 = vpop.f32.mrf.mxu0  ;;  %v1126_v5 = vpop.f32.mrf.mxu1 }
  0xfe   :  { %v179_v6 = vadd.f32 %v1738_v21, %v178_v4  ;;  %1193 = vmatmul.mubr.f32.gmra.mxu1 %v273_v3  ;;  %v286_v55 = vmax.f32 %v239_v54, 0.0  ;;  %v1864_v3 = vld [vmem:[%s2202_s4] ss:$0 sm:$0xff] }
  0xff   :  { %v1090_v7 = vpop.f32.mrf.mxu0  ;;  %1195 = vmatprep.mubr.msk.f32.mxu1 %vm1334_vm0, %v1333_v0  ;;  %v1788_v8 = vpop.f32.mrf.mxu1 }
 0x100   :  { %v274_v9 = vmax.f32 %v179_v6, 0.0  ;;  %v244_v56 = vadd.f32 %v1738_v21, %v1788_v8 }
 0x101   :  { %v183_v10 = vpop.f32.mrf.mxu0  ;;  %v1129_v11 = vpop.f32.mrf.mxu1 }
 0x102   :  { %v184_v12 = vadd.f32 %v1738_v21, %v183_v10  ;;  %1196 = vmatmul.mubr.f32.gmra.mxu1 %v274_v9  ;;  %v287_v57 = vmax.f32 %v244_v56, 0.0 }
 0x103   :  { %v1093_v13 = vpop.f32.mrf.mxu0  ;;  %1198 = vmatprep.mubr.msk.f32.mxu1 %vm1334_vm0, %v1333_v0  ;;  %v1793_v14 = vpop.f32.mrf.mxu1 }
 0x104   :  { %v275_v15 = vmax.f32 %v184_v12, 0.0  ;;  %v249_v58 = vadd.f32 %v1738_v21, %v1793_v14 }
 0x105   :  { %v188_v16 = vpop.f32.mrf.mxu0  ;;  %v1132_v17 = vpop.f32.mrf.mxu1 }
 0x106   :  { %v189_v18 = vadd.f32 %v1738_v21, %v188_v16  ;;  %1199 = vmatmul.mubr.f32.gmra.mxu1 %v275_v15  ;;  %v288_v59 = vmax.f32 %v249_v58, 0.0 }
 0x107   :  { %v1096_v19 = vpop.f32.mrf.mxu0  ;;  %1201 = vmatprep.mubr.msk.f32.mxu1 %vm1334_vm0, %v1333_v0  ;;  %v1798_v20 = vpop.f32.mrf.mxu1 }
 0x108   :  { %v276_v22 = vmax.f32 %v189_v18, 0.0  ;;  %v254_v60 = vadd.f32 %v1738_v21, %v1798_v20 }
 0x109   :  { %v193_v23 = vpop.f32.mrf.mxu0  ;;  %v1135_v24 = vpop.f32.mrf.mxu1 }
 0x10a   :  { %v194_v25 = vadd.f32 %v1738_v21, %v193_v23  ;;  %1202 = vmatmul.mubr.f32.gmra.mxu1 %v276_v22  ;;  %v289_v61 = vmax.f32 %v254_v60, 0.0 }
 0x10b   :  { %v1099_v26 = vpop.f32.mrf.mxu0  ;;  %1204 = vmatprep.mubr.msk.f32.mxu1 %vm1334_vm0, %v1333_v0  ;;  %v258_v27 = vpop.f32.mrf.mxu1 }
 0x10c   :  { %v277_v28 = vmax.f32 %v194_v25, 0.0  ;;  %v259_v62 = vadd.f32 %v1738_v21, %v258_v27 }
 0x10d   :  { %v198_v30 = vpop.f32.mrf.mxu0  ;;  %v1138_v31 = vpop.f32.mrf.mxu1 }
 0x10e   :  { %v199_v32 = vadd.f32 %v1738_v21, %v198_v30  ;;  %1205 = vmatmul.mubr.f32.gmra.mxu1 %v277_v28  ;;  %v290_v63 = vmax.f32 %v259_v62, 0.0 }
 0x10f   :  { %v1102_v33 = vpop.f32.mrf.mxu0  ;;  %1207 = vmatprep.mubr.msk.f32.mxu1 %vm1334_vm0, %v1333_v0  ;;  %v263_v34 = vpop.f32.mrf.mxu1 }
 0x110   :  { %v278_v36 = vmax.f32 %v199_v32, 0.0  ;;  %v264_v1 = vadd.f32 %v1738_v21, %v263_v34 }
 0x111   :  { %v203_v37 = vpop.f32.mrf.mxu0  ;;  %v1141_v38 = vpop.f32.mrf.mxu1 }
 0x112   :  { %v204_v39 = vadd.f32 %v1738_v21, %v203_v37  ;;  %1208 = vmatmul.mubr.f32.gmra.mxu1 %v278_v36  ;;  %v291_v2 = vmax.f32 %v264_v1, 0.0 }
 0x113   :  { %v1105_v42 = vpop.f32.mrf.mxu0  ;;  %1210 = vmatprep.mubr.msk.f32.mxu1 %vm1334_vm0, %v1333_v0 }
 0x114   :  { %v279_v43 = vmax.f32 %v204_v39, 0.0 }
 0x116   :  { %1211 = vmatmul.mubr.f32.gmra.mxu1 %v279_v43 }
 0x117   :  { %1213 = vmatprep.mubr.msk.f32.mxu1 %vm1334_vm0, %v1333_v0 }
 0x11a   :  { %1214 = vmatmul.mubr.f32.gmra.mxu1 %v280_v44 }
 0x11b   :  { %1216 = vmatprep.mubr.msk.f32.mxu1 %vm1334_vm0, %v1333_v0 }
 0x11e   :  { %1217 = vmatmul.mubr.f32.gmra.mxu1 %v281_v46 }
 0x11f   :  { %1219 = vmatprep.mubr.msk.f32.mxu1 %vm1334_vm0, %v1333_v0 }
 0x122   :  { %1220 = vmatmul.mubr.f32.gmra.mxu1 %v282_v29 }
 0x123   :  { %1222 = vmatprep.mubr.msk.f32.mxu1 %vm1334_vm0, %v1333_v0 }
 0x126   :  { %1223 = vmatmul.mubr.f32.gmra.mxu1 %v283_v35 }
 0x127   :  { %1225 = vmatprep.mubr.msk.f32.mxu1 %vm1334_vm0, %v1333_v0 }
 0x12a   :  { %1226 = vmatmul.mubr.f32.gmra.mxu1 %v284_v41 }
 0x12b   :  { %1228 = vmatprep.mubr.msk.f32.mxu1 %vm1334_vm0, %v1333_v0 }
 0x12e   :  { %1229 = vmatmul.mubr.f32.gmra.mxu1 %v285_v53 }
 0x12f   :  { %1231 = vmatprep.mubr.msk.f32.mxu1 %vm1334_vm0, %v1333_v0 }
 0x132   :  { %1232 = vmatmul.mubr.f32.gmra.mxu1 %v286_v55 }
 0x133   :  { %1234 = vmatprep.mubr.msk.f32.mxu1 %vm1334_vm0, %v1333_v0 }
 0x136   :  { %1235 = vmatmul.mubr.f32.gmra.mxu1 %v287_v57 }
 0x137   :  { %1237 = vmatprep.mubr.msk.f32.mxu1 %vm1334_vm0, %v1333_v0 }
 0x13a   :  { %1238 = vmatmul.mubr.f32.gmra.mxu1 %v288_v59 }
 0x13b   :  { %1240 = vmatprep.mubr.msk.f32.mxu1 %vm1334_vm0, %v1333_v0 }
 0x13e   :  { %1241 = vmatmul.mubr.f32.gmra.mxu1 %v289_v61 }
 0x13f   :  { %1243 = vmatprep.mubr.msk.f32.mxu1 %vm1334_vm0, %v1333_v0 }
 0x142   :  { %1244 = vmatmul.mubr.f32.gmra.mxu1 %v290_v63 }
 0x143   :  { %1246 = vmatprep.mubr.msk.f32.mxu1 %vm1334_vm0, %v1333_v0 }
 0x146   :  { %1247 = vmatmul.mubr.f32.gmra.mxu1 %v291_v2 }
 0x1a6   :  { %v381_v4 = vpop.f32.mrf.mxu1 }
 0x1a7   :  { %v382_v5 = vadd.f32 %v1864_v3, %v381_v4 }
 0x1a8   :  { %v1176_v6 = vpop.f32.mrf.mxu1 }
 0x1a9   :  { %v505_v7 = vmax.f32 %v382_v5, 0.0 }
 0x1aa   :  { %v386_v21 = vpop.f32.mrf.mxu1 }
 0x1ab   :  { %v387_v8 = vadd.f32 %v1864_v3, %v386_v21  ;;  %639 = vmatmul.mubr.f32.vlgmr.msra.gmra.mxu0 %v505_v7 }
 0x1ac   :  { %v1179_v9 = vpop.f32.mrf.mxu1  ;;  %644 = vmatprep.mubr.f32.mxu0 %v1333_v0 }
 0x1ad   :  { %v506_v10 = vmax.f32 %v387_v8, 0.0 }
 0x1ae   :  { %v391_v11 = vpop.f32.mrf.mxu1 }
 0x1af   :  { %v392_v12 = vadd.f32 %v1864_v3, %v391_v11  ;;  %645 = vmatmul.mubr.f32.gmra.mxu0 %v506_v10 }
 0x1b0   :  { %v1182_v13 = vpop.f32.mrf.mxu1  ;;  %650 = vmatprep.mubr.f32.mxu0 %v1333_v0 }
 0x1b1   :  { %v507_v14 = vmax.f32 %v392_v12, 0.0 }
 0x1b2   :  { %v396_v15 = vpop.f32.mrf.mxu1 }
 0x1b3   :  { %v397_v16 = vadd.f32 %v1864_v3, %v396_v15  ;;  %651 = vmatmul.mubr.f32.gmra.mxu0 %v507_v14 }
 0x1b4   :  { %v1185_v17 = vpop.f32.mrf.mxu1  ;;  %656 = vmatprep.mubr.f32.mxu0 %v1333_v0 }
 0x1b5   :  { %v508_v18 = vmax.f32 %v397_v16, 0.0 }
 0x1b6   :  { %v401_v19 = vpop.f32.mrf.mxu1 }
 0x1b7   :  { %v402_v20 = vadd.f32 %v1864_v3, %v401_v19  ;;  %657 = vmatmul.mubr.f32.gmra.mxu0 %v508_v18 }
 0x1b8   :  { %v1188_v22 = vpop.f32.mrf.mxu1  ;;  %662 = vmatprep.mubr.f32.mxu0 %v1333_v0 }
 0x1b9   :  { %v509_v23 = vmax.f32 %v402_v20, 0.0 }
 0x1ba   :  { %v406_v24 = vpop.f32.mrf.mxu1 }
 0x1bb   :  { %v407_v25 = vadd.f32 %v1864_v3, %v406_v24  ;;  %663 = vmatmul.mubr.f32.gmra.mxu0 %v509_v23 }
 0x1bc   :  { %v1191_v26 = vpop.f32.mrf.mxu1  ;;  %668 = vmatprep.mubr.f32.mxu0 %v1333_v0 }
 0x1bd   :  { %v510_v27 = vmax.f32 %v407_v25, 0.0 }
 0x1be   :  { %v411_v28 = vpop.f32.mrf.mxu1 }
 0x1bf   :  { %v412_v30 = vadd.f32 %v1864_v3, %v411_v28  ;;  %669 = vmatmul.mubr.f32.gmra.mxu0 %v510_v27 }
 0x1c0   :  { %v1194_v31 = vpop.f32.mrf.mxu1  ;;  %674 = vmatprep.mubr.f32.mxu0 %v1333_v0 }
 0x1c1   :  { %v511_v32 = vmax.f32 %v412_v30, 0.0 }
 0x1c2   :  { %v416_v33 = vpop.f32.mrf.mxu1 }
 0x1c3   :  { %v417_v34 = vadd.f32 %v1864_v3, %v416_v33  ;;  %675 = vmatmul.mubr.f32.gmra.mxu0 %v511_v32 }
 0x1c4   :  { %v1197_v36 = vpop.f32.mrf.mxu1  ;;  %680 = vmatprep.mubr.f32.mxu0 %v1333_v0 }
 0x1c5   :  { %v512_v37 = vmax.f32 %v417_v34, 0.0 }
 0x1c6   :  { %v421_v38 = vpop.f32.mrf.mxu1 }
 0x1c7   :  { %v422_v39 = vadd.f32 %v1864_v3, %v421_v38  ;;  %681 = vmatmul.mubr.f32.gmra.mxu0 %v512_v37 }
 0x1c8   :  { %v1200_v40 = vpop.f32.mrf.mxu1  ;;  %686 = vmatprep.mubr.f32.mxu0 %v1333_v0 }
 0x1c9   :  { %v513_v42 = vmax.f32 %v422_v39, 0.0 }
 0x1ca   :  { %v426_v43 = vpop.f32.mrf.mxu1 }
 0x1cb   :  { %v427_v44 = vadd.f32 %v1864_v3, %v426_v43  ;;  %687 = vmatmul.mubr.f32.gmra.mxu0 %v513_v42 }
 0x1cc   :  { %v1203_v45 = vpop.f32.mrf.mxu1  ;;  %692 = vmatprep.mubr.f32.mxu0 %v1333_v0 }
 0x1cd   :  { %v514_v46 = vmax.f32 %v427_v44, 0.0  ;;  %v564_v45 = vlaneseq }
 0x1ce   :  { %v431_v48 = vpop.f32.mrf.mxu1 }
 0x1cf   :  { %v432_v29 = vadd.f32 %v1864_v3, %v431_v48  ;;  %693 = vmatmul.mubr.f32.gmra.mxu0 %v514_v46  ;;  %v565_v46 = vshrl.u32 %v564_v45, 7 }
 0x1d0   :  { %v1206_v49 = vpop.f32.mrf.mxu1  ;;  %698 = vmatprep.mubr.f32.mxu0 %v1333_v0 }
 0x1d1   :  { %v515_v35 = vmax.f32 %v432_v29, 0.0  ;;  %v566_v48 = vsub.s32 0, %v565_v46  ;;  %v562_v29 = vld [vmem:[%s2203_s6] sm:$0x3]  ;;  %v570_v49 = vsub.s32 1, %v565_v46 }
 0x1d2   :  { %v436_v50 = vpop.f32.mrf.mxu1 }
 0x1d3   :  { %v437_v41 = vadd.f32 %v1864_v3, %v436_v50  ;;  %699 = vmatmul.mubr.f32.gmra.mxu0 %v515_v35  ;;  %v1918_v35 = vrot.slane %v562_v29, %v566_v48  ;;  %v1920_v50 = vrot.slane %v562_v29, %v570_v49 }
 0x1d4   :  { %v1209_v51 = vpop.f32.mrf.mxu1  ;;  %704 = vmatprep.mubr.f32.mxu0 %v1333_v0 }
 0x1d5   :  { %v516_v47 = vmax.f32 %v437_v41, 0.0 }
 0x1d6   :  { %v441_v52 = vpop.f32.mrf.mxu1 }
 0x1d7   :  { %v442_v53 = vadd.f32 %v1864_v3, %v441_v52  ;;  %705 = vmatmul.mubr.f32.gmra.mxu0 %v516_v47 }
 0x1d8   :  { %v1212_v54 = vpop.f32.mrf.mxu1  ;;  %710 = vmatprep.mubr.f32.mxu0 %v1333_v0 }
 0x1d9   :  { %v517_v55 = vmax.f32 %v442_v53, 0.0 }
 0x1da   :  { %v446_v56 = vpop.f32.mrf.mxu1 }
 0x1db   :  { %v447_v57 = vadd.f32 %v1864_v3, %v446_v56  ;;  %711 = vmatmul.mubr.f32.gmra.mxu0 %v517_v55 }
 0x1dc   :  { %v1215_v58 = vpop.f32.mrf.mxu1  ;;  %716 = vmatprep.mubr.f32.mxu0 %v1333_v0 }
 0x1dd   :  { %v518_v59 = vmax.f32 %v447_v57, 0.0 }
 0x1de   :  { %v451_v60 = vpop.f32.mrf.mxu1 }
 0x1df   :  { %v452_v61 = vadd.f32 %v1864_v3, %v451_v60  ;;  %717 = vmatmul.mubr.f32.gmra.mxu0 %v518_v59 }
 0x1e0   :  { %v1218_v62 = vpop.f32.mrf.mxu1  ;;  %722 = vmatprep.mubr.f32.mxu0 %v1333_v0 }
 0x1e1   :  { %v519_v63 = vmax.f32 %v452_v61, 0.0 }
 0x1e2   :  { %v456_v1 = vpop.f32.mrf.mxu1 }
 0x1e3   :  { %v457_v2 = vadd.f32 %v1864_v3, %v456_v1  ;;  %723 = vmatmul.mubr.f32.gmra.mxu0 %v519_v63 }
 0x1e4   :  { %v1221_v4 = vpop.f32.mrf.mxu1  ;;  %728 = vmatprep.mubr.f32.mxu0 %v1333_v0 }
 0x1e5   :  { %v520_v5 = vmax.f32 %v457_v2, 0.0 }
 0x1e6   :  { %v461_v6 = vpop.f32.mrf.mxu1 }
 0x1e7   :  { %v462_v7 = vadd.f32 %v1864_v3, %v461_v6  ;;  %729 = vmatmul.mubr.f32.gmra.mxu0 %v520_v5 }
 0x1e8   :  { %v1224_v21 = vpop.f32.mrf.mxu1  ;;  %734 = vmatprep.mubr.f32.mxu0 %v1333_v0 }
 0x1e9   :  { %v521_v8 = vmax.f32 %v462_v7, 0.0 }
 0x1ea   :  { %v466_v9 = vpop.f32.mrf.mxu1 }
 0x1eb   :  { %v467_v10 = vadd.f32 %v1864_v3, %v466_v9  ;;  %735 = vmatmul.mubr.f32.gmra.mxu0 %v521_v8 }
 0x1ec   :  { %v1227_v11 = vpop.f32.mrf.mxu1  ;;  %740 = vmatprep.mubr.f32.mxu0 %v1333_v0 }
 0x1ed   :  { %v522_v12 = vmax.f32 %v467_v10, 0.0 }
 0x1ee   :  { %v471_v13 = vpop.f32.mrf.mxu1 }
 0x1ef   :  { %v472_v14 = vadd.f32 %v1864_v3, %v471_v13  ;;  %741 = vmatmul.mubr.f32.gmra.mxu0 %v522_v12 }
 0x1f0   :  { %v1230_v15 = vpop.f32.mrf.mxu1  ;;  %746 = vmatprep.mubr.f32.mxu0 %v1333_v0 }
 0x1f1   :  { %v523_v16 = vmax.f32 %v472_v14, 0.0 }
 0x1f2   :  { %v476_v17 = vpop.f32.mrf.mxu1 }
 0x1f3   :  { %v477_v18 = vadd.f32 %v1864_v3, %v476_v17  ;;  %747 = vmatmul.mubr.f32.gmra.mxu0 %v523_v16 }
 0x1f4   :  { %v1233_v19 = vpop.f32.mrf.mxu1  ;;  %752 = vmatprep.mubr.f32.mxu0 %v1333_v0 }
 0x1f5   :  { %v524_v20 = vmax.f32 %v477_v18, 0.0 }
 0x1f6   :  { %v481_v22 = vpop.f32.mrf.mxu1 }
 0x1f7   :  { %v482_v23 = vadd.f32 %v1864_v3, %v481_v22  ;;  %753 = vmatmul.mubr.f32.gmra.mxu0 %v524_v20 }
 0x1f8   :  { %v1236_v24 = vpop.f32.mrf.mxu1  ;;  %758 = vmatprep.mubr.f32.mxu0 %v1333_v0 }
 0x1f9   :  { %v525_v25 = vmax.f32 %v482_v23, 0.0 }
 0x1fa   :  { %v486_v26 = vpop.f32.mrf.mxu1 }
 0x1fb   :  { %v487_v27 = vadd.f32 %v1864_v3, %v486_v26  ;;  %759 = vmatmul.mubr.f32.gmra.mxu0 %v525_v25 }
 0x1fc   :  { %v1239_v28 = vpop.f32.mrf.mxu1  ;;  %764 = vmatprep.mubr.f32.mxu0 %v1333_v0 }
 0x1fd   :  { %v526_v30 = vmax.f32 %v487_v27, 0.0 }
 0x1fe   :  { %v491_v31 = vpop.f32.mrf.mxu1 }
 0x1ff   :  { %v492_v32 = vadd.f32 %v1864_v3, %v491_v31  ;;  %765 = vmatmul.mubr.f32.gmra.mxu0 %v526_v30 }
 0x200   :  { %v1242_v33 = vpop.f32.mrf.mxu1  ;;  %770 = vmatprep.mubr.f32.mxu0 %v1333_v0 }
 0x201   :  { %v527_v34 = vmax.f32 %v492_v32, 0.0 }
 0x202   :  { %v496_v36 = vpop.f32.mrf.mxu1 }
 0x203   :  { %v497_v37 = vadd.f32 %v1864_v3, %v496_v36  ;;  %771 = vmatmul.mubr.f32.gmra.mxu0 %v527_v34 }
 0x204   :  { %v1245_v38 = vpop.f32.mrf.mxu1  ;;  %776 = vmatprep.mubr.f32.mxu0 %v1333_v0 }
 0x205   :  { %v528_v39 = vmax.f32 %v497_v37, 0.0 }
 0x206   :  { %v501_v40 = vpop.f32.mrf.mxu1 }
 0x207   :  { %v502_v42 = vadd.f32 %v1864_v3, %v501_v40  ;;  %777 = vmatmul.mubr.f32.gmra.mxu0 %v528_v39 }
 0x208   :  { %v1248_v43 = vpop.f32.mrf.mxu1  ;;  %782 = vmatprep.mubr.f32.mxu0 %v1333_v0 }
 0x209   :  { %v529_v44 = vmax.f32 %v502_v42, 0.0 }
 0x20b   :  { %783 = vmatmul.mubr.f32.gmra.mxu0 %v529_v44 }
 0x26b   :  { %v640_v41 = vpop.f32.mrf.mxu0 }
 0x26c   :  { %v641_v3 = vadd.f32 %v640_v41, %v1918_v35 }
 0x26d   :  { %v642_v51 = vpop.f32.mrf.mxu0 }
 0x26e   :  { %789 = vst [vmem:[%s2204_s7] sm:$0xff] %v641_v3  ;;  %v643_v0 = vadd.f32 %v642_v51, %v1920_v50 }
 0x26f   :  { %v646_v47 = vpop.f32.mrf.mxu0 }
 0x270   :  { %814 = vst [vmem:[%s2205_s9] sm:$0xff] %v643_v0  ;;  %v839_v52 = vmul.f32 0.5, %v643_v0  ;;  %v647_v53 = vadd.f32 %v646_v47, %v1918_v35 }
 0x271   :  { %v648_v54 = vpop.f32.mrf.mxu0 }
 0x272   :  { %v864_v55 = vmul.f32 1.442695, %v839_v52  ;;  %790 = vst [vmem:[%s2204_s7 + $0x8] sm:$0xff] %v647_v53  ;;  %v649_v56 = vadd.f32 %v648_v54, %v1920_v50 }
 0x273   :  { %v652_v57 = vpop.f32.mrf.mxu0 }
 0x274   :  { %1283 = vpow2.f32 %v864_v55  ;;  %815 = vst [vmem:[%s2205_s9 + $0x8] sm:$0xff] %v649_v56  ;;  %v840_v58 = vmul.f32 0.5, %v649_v56  ;;  %v653_v59 = vadd.f32 %v652_v57, %v1918_v35 }
 0x275   :  { %v654_v60 = vpop.f32.mrf.mxu0 }
 0x276   :  { %v866_v61 = vmul.f32 1.442695, %v840_v58  ;;  %791 = vst [vmem:[%s2204_s7 + $0x10] sm:$0xff] %v653_v59  ;;  %v655_v62 = vadd.f32 %v654_v60, %v1920_v50 }
 0x277   :  { %v658_v63 = vpop.f32.mrf.mxu0 }
 0x278   :  { %1285 = vpow2.f32 %v866_v61  ;;  %816 = vst [vmem:[%s2205_s9 + $0x10] sm:$0xff] %v655_v62  ;;  %v841_v1 = vmul.f32 0.5, %v655_v62  ;;  %v659_v2 = vadd.f32 %v658_v63, %v1918_v35 }
 0x279   :  { %v660_v4 = vpop.f32.mrf.mxu0 }
 0x27a   :  { %v868_v5 = vmul.f32 1.442695, %v841_v1  ;;  %792 = vst [vmem:[%s2204_s7 + $0x18] sm:$0xff] %v659_v2  ;;  %v661_v6 = vadd.f32 %v660_v4, %v1920_v50 }
 0x27b   :  { %v664_v7 = vpop.f32.mrf.mxu0 }
 0x27c   :  { %1287 = vpow2.f32 %v868_v5  ;;  %817 = vst [vmem:[%s2205_s9 + $0x18] sm:$0xff] %v661_v6  ;;  %v842_v21 = vmul.f32 0.5, %v661_v6  ;;  %v665_v8 = vadd.f32 %v664_v7, %v1918_v35 }
 0x27d   :  { %v666_v9 = vpop.f32.mrf.mxu0 }
 0x27e   :  { %v870_v10 = vmul.f32 1.442695, %v842_v21  ;;  %793 = vst [vmem:[%s2204_s7 + $0x20] sm:$0xff] %v665_v8  ;;  %v667_v11 = vadd.f32 %v666_v9, %v1920_v50 }
 0x27f   :  { %v670_v12 = vpop.f32.mrf.mxu0 }
 0x280   :  { %1289 = vpow2.f32 %v870_v10  ;;  %818 = vst [vmem:[%s2205_s9 + $0x20] sm:$0xff] %v667_v11  ;;  %v843_v13 = vmul.f32 0.5, %v667_v11  ;;  %v671_v14 = vadd.f32 %v670_v12, %v1918_v35 }
 0x281   :  { %v1284_v15 = vpop.eup %1283  ;;  %v672_v16 = vpop.f32.mrf.mxu0 }
 0x282   :  { %914 = vst [vmem:[%s2206_s8] sm:$0xff] %v1284_v15  ;;  %v872_v17 = vmul.f32 1.442695, %v843_v13  ;;  %794 = vst [vmem:[%s2204_s7 + $0x28] sm:$0xff] %v671_v14  ;;  %v673_v18 = vadd.f32 %v672_v16, %v1920_v50 }
 0x283   :  { %v676_v19 = vpop.f32.mrf.mxu0 }
 0x284   :  { %1291 = vpow2.f32 %v872_v17  ;;  %819 = vst [vmem:[%s2205_s9 + $0x28] sm:$0xff] %v673_v18  ;;  %v844_v20 = vmul.f32 0.5, %v673_v18  ;;  %v677_v22 = vadd.f32 %v676_v19, %v1918_v35 }
 0x285   :  { %v1286_v23 = vpop.eup %1285  ;;  %v678_v24 = vpop.f32.mrf.mxu0 }
 0x286   :  { %915 = vst [vmem:[%s2206_s8 + $0x8] sm:$0xff] %v1286_v23  ;;  %v874_v25 = vmul.f32 1.442695, %v844_v20  ;;  %795 = vst [vmem:[%s2204_s7 + $0x30] sm:$0xff] %v677_v22  ;;  %v679_v26 = vadd.f32 %v678_v24, %v1920_v50 }
 0x287   :  { %v682_v27 = vpop.f32.mrf.mxu0 }
 0x288   :  { %1293 = vpow2.f32 %v874_v25  ;;  %820 = vst [vmem:[%s2205_s9 + $0x30] sm:$0xff] %v679_v26  ;;  %v845_v28 = vmul.f32 0.5, %v679_v26  ;;  %v683_v30 = vadd.f32 %v682_v27, %v1918_v35 }
 0x289   :  { %v1288_v31 = vpop.eup %1287  ;;  %v684_v32 = vpop.f32.mrf.mxu0 }
 0x28a   :  { %916 = vst [vmem:[%s2206_s8 + $0x10] sm:$0xff] %v1288_v31  ;;  %v876_v33 = vmul.f32 1.442695, %v845_v28  ;;  %796 = vst [vmem:[%s2204_s7 + $0x38] sm:$0xff] %v683_v30  ;;  %v685_v34 = vadd.f32 %v684_v32, %v1920_v50 }
 0x28b   :  { %v688_v36 = vpop.f32.mrf.mxu0 }
 0x28c   :  { %1295 = vpow2.f32 %v876_v33  ;;  %821 = vst [vmem:[%s2205_s9 + $0x38] sm:$0xff] %v685_v34  ;;  %v846_v37 = vmul.f32 0.5, %v685_v34  ;;  %v689_v38 = vadd.f32 %v688_v36, %v1918_v35 }
 0x28d   :  { %v1290_v39 = vpop.eup %1289  ;;  %v690_v40 = vpop.f32.mrf.mxu0 }
 0x28e   :  { %917 = vst [vmem:[%s2206_s8 + $0x18] sm:$0xff] %v1290_v39  ;;  %v878_v42 = vmul.f32 1.442695, %v846_v37  ;;  %797 = vst [vmem:[%s2204_s7 + $0x40] sm:$0xff] %v689_v38  ;;  %v691_v43 = vadd.f32 %v690_v40, %v1920_v50 }
 0x28f   :  { %v694_v44 = vpop.f32.mrf.mxu0 }
 0x290   :  { %1297 = vpow2.f32 %v878_v42  ;;  %822 = vst [vmem:[%s2205_s9 + $0x40] sm:$0xff] %v691_v43  ;;  %v847_v45 = vmul.f32 0.5, %v691_v43  ;;  %v695_v46 = vadd.f32 %v694_v44, %v1918_v35 }
 0x291   :  { %v1292_v48 = vpop.eup %1291  ;;  %v696_v29 = vpop.f32.mrf.mxu0 }
 0x292   :  { %918 = vst [vmem:[%s2206_s8 + $0x20] sm:$0xff] %v1292_v48  ;;  %v880_v49 = vmul.f32 1.442695, %v847_v45  ;;  %798 = vst [vmem:[%s2204_s7 + $0x48] sm:$0xff] %v695_v46  ;;  %v697_v41 = vadd.f32 %v696_v29, %v1920_v50 }
 0x293   :  { %v700_v3 = vpop.f32.mrf.mxu0 }
 0x294   :  { %1299 = vpow2.f32 %v880_v49  ;;  %823 = vst [vmem:[%s2205_s9 + $0x48] sm:$0xff] %v697_v41  ;;  %v848_v51 = vmul.f32 0.5, %v697_v41  ;;  %v701_v0 = vadd.f32 %v700_v3, %v1918_v35 }
 0x295   :  { %v1294_v47 = vpop.eup %1293  ;;  %v702_v52 = vpop.f32.mrf.mxu0 }
 0x296   :  { %919 = vst [vmem:[%s2206_s8 + $0x28] sm:$0xff] %v1294_v47  ;;  %v882_v53 = vmul.f32 1.442695, %v848_v51  ;;  %799 = vst [vmem:[%s2204_s7 + $0x50] sm:$0xff] %v701_v0  ;;  %v703_v54 = vadd.f32 %v702_v52, %v1920_v50 }
 0x297   :  { %v706_v55 = vpop.f32.mrf.mxu0 }
 0x298   :  { %1301 = vpow2.f32 %v882_v53  ;;  %824 = vst [vmem:[%s2205_s9 + $0x50] sm:$0xff] %v703_v54  ;;  %v849_v56 = vmul.f32 0.5, %v703_v54  ;;  %v707_v57 = vadd.f32 %v706_v55, %v1918_v35 }
 0x299   :  { %v1296_v58 = vpop.eup %1295  ;;  %v708_v59 = vpop.f32.mrf.mxu0 }
 0x29a   :  { %920 = vst [vmem:[%s2206_s8 + $0x30] sm:$0xff] %v1296_v58  ;;  %v884_v60 = vmul.f32 1.442695, %v849_v56  ;;  %800 = vst [vmem:[%s2204_s7 + $0x58] sm:$0xff] %v707_v57  ;;  %v709_v61 = vadd.f32 %v708_v59, %v1920_v50 }
 0x29b   :  { %v712_v62 = vpop.f32.mrf.mxu0 }
 0x29c   :  { %1303 = vpow2.f32 %v884_v60  ;;  %825 = vst [vmem:[%s2205_s9 + $0x58] sm:$0xff] %v709_v61  ;;  %v850_v63 = vmul.f32 0.5, %v709_v61  ;;  %v713_v1 = vadd.f32 %v712_v62, %v1918_v35 }
 0x29d   :  { %v1298_v2 = vpop.eup %1297  ;;  %v714_v4 = vpop.f32.mrf.mxu0 }
 0x29e   :  { %921 = vst [vmem:[%s2206_s8 + $0x38] sm:$0xff] %v1298_v2  ;;  %v886_v5 = vmul.f32 1.442695, %v850_v63  ;;  %801 = vst [vmem:[%s2204_s7 + $0x60] sm:$0xff] %v713_v1  ;;  %v715_v6 = vadd.f32 %v714_v4, %v1920_v50 }
 0x29f   :  { %v718_v7 = vpop.f32.mrf.mxu0 }
 0x2a0   :  { %1305 = vpow2.f32 %v886_v5  ;;  %826 = vst [vmem:[%s2205_s9 + $0x60] sm:$0xff] %v715_v6  ;;  %v851_v21 = vmul.f32 0.5, %v715_v6  ;;  %v719_v8 = vadd.f32 %v718_v7, %v1918_v35 }
 0x2a1   :  { %v1300_v9 = vpop.eup %1299  ;;  %v720_v10 = vpop.f32.mrf.mxu0 }
 0x2a2   :  { %922 = vst [vmem:[%s2206_s8 + $0x40] sm:$0xff] %v1300_v9  ;;  %v888_v11 = vmul.f32 1.442695, %v851_v21  ;;  %802 = vst [vmem:[%s2204_s7 + $0x68] sm:$0xff] %v719_v8  ;;  %v721_v12 = vadd.f32 %v720_v10, %v1920_v50 }
 0x2a3   :  { %v724_v13 = vpop.f32.mrf.mxu0 }
 0x2a4   :  { %1307 = vpow2.f32 %v888_v11  ;;  %827 = vst [vmem:[%s2205_s9 + $0x68] sm:$0xff] %v721_v12  ;;  %v852_v14 = vmul.f32 0.5, %v721_v12  ;;  %v725_v15 = vadd.f32 %v724_v13, %v1918_v35 }
 0x2a5   :  { %v1302_v16 = vpop.eup %1301  ;;  %v726_v17 = vpop.f32.mrf.mxu0 }
 0x2a6   :  { %923 = vst [vmem:[%s2206_s8 + $0x48] sm:$0xff] %v1302_v16  ;;  %v890_v18 = vmul.f32 1.442695, %v852_v14  ;;  %803 = vst [vmem:[%s2204_s7 + $0x70] sm:$0xff] %v725_v15  ;;  %v727_v19 = vadd.f32 %v726_v17, %v1920_v50 }
 0x2a7   :  { %v730_v20 = vpop.f32.mrf.mxu0 }
 0x2a8   :  { %1309 = vpow2.f32 %v890_v18  ;;  %828 = vst [vmem:[%s2205_s9 + $0x70] sm:$0xff] %v727_v19  ;;  %v853_v22 = vmul.f32 0.5, %v727_v19  ;;  %v731_v23 = vadd.f32 %v730_v20, %v1918_v35 }
 0x2a9   :  { %v1304_v24 = vpop.eup %1303  ;;  %v732_v25 = vpop.f32.mrf.mxu0 }
 0x2aa   :  { %924 = vst [vmem:[%s2206_s8 + $0x50] sm:$0xff] %v1304_v24  ;;  %v892_v26 = vmul.f32 1.442695, %v853_v22  ;;  %804 = vst [vmem:[%s2204_s7 + $0x78] sm:$0xff] %v731_v23  ;;  %v733_v27 = vadd.f32 %v732_v25, %v1920_v50 }
 0x2ab   :  { %v736_v28 = vpop.f32.mrf.mxu0 }
 0x2ac   :  { %1311 = vpow2.f32 %v892_v26  ;;  %829 = vst [vmem:[%s2205_s9 + $0x78] sm:$0xff] %v733_v27  ;;  %v854_v30 = vmul.f32 0.5, %v733_v27  ;;  %v737_v31 = vadd.f32 %v736_v28, %v1918_v35 }
 0x2ad   :  { %v1306_v32 = vpop.eup %1305  ;;  %v738_v33 = vpop.f32.mrf.mxu0 }
 0x2ae   :  { %925 = vst [vmem:[%s2206_s8 + $0x58] sm:$0xff] %v1306_v32  ;;  %v894_v34 = vmul.f32 1.442695, %v854_v30  ;;  %805 = vst [vmem:[%s2204_s7 + $0x80] sm:$0xff] %v737_v31  ;;  %v739_v36 = vadd.f32 %v738_v33, %v1920_v50 }
 0x2af   :  { %v742_v37 = vpop.f32.mrf.mxu0 }
 0x2b0   :  { %1313 = vpow2.f32 %v894_v34  ;;  %830 = vst [vmem:[%s2205_s9 + $0x80] sm:$0xff] %v739_v36  ;;  %v855_v38 = vmul.f32 0.5, %v739_v36  ;;  %v743_v39 = vadd.f32 %v742_v37, %v1918_v35 }
 0x2b1   :  { %v1308_v40 = vpop.eup %1307  ;;  %v744_v42 = vpop.f32.mrf.mxu0 }
 0x2b2   :  { %926 = vst [vmem:[%s2206_s8 + $0x60] sm:$0xff] %v1308_v40  ;;  %v896_v43 = vmul.f32 1.442695, %v855_v38  ;;  %806 = vst [vmem:[%s2204_s7 + $0x88] sm:$0xff] %v743_v39  ;;  %v745_v44 = vadd.f32 %v744_v42, %v1920_v50 }
 0x2b3   :  { %v748_v45 = vpop.f32.mrf.mxu0 }
 0x2b4   :  { %1315 = vpow2.f32 %v896_v43  ;;  %831 = vst [vmem:[%s2205_s9 + $0x88] sm:$0xff] %v745_v44  ;;  %v856_v46 = vmul.f32 0.5, %v745_v44  ;;  %v749_v48 = vadd.f32 %v748_v45, %v1918_v35 }
 0x2b5   :  { %v1310_v29 = vpop.eup %1309  ;;  %v750_v49 = vpop.f32.mrf.mxu0 }
 0x2b6   :  { %927 = vst [vmem:[%s2206_s8 + $0x68] sm:$0xff] %v1310_v29  ;;  %v898_v41 = vmul.f32 1.442695, %v856_v46  ;;  %807 = vst [vmem:[%s2204_s7 + $0x90] sm:$0xff] %v749_v48  ;;  %v751_v3 = vadd.f32 %v750_v49, %v1920_v50 }
 0x2b7   :  { %v754_v51 = vpop.f32.mrf.mxu0 }
 0x2b8   :  { %1317 = vpow2.f32 %v898_v41  ;;  %832 = vst [vmem:[%s2205_s9 + $0x90] sm:$0xff] %v751_v3  ;;  %v857_v0 = vmul.f32 0.5, %v751_v3  ;;  %v755_v47 = vadd.f32 %v754_v51, %v1918_v35 }
 0x2b9   :  { %v1312_v52 = vpop.eup %1311  ;;  %v756_v53 = vpop.f32.mrf.mxu0 }
 0x2ba   :  { %928 = vst [vmem:[%s2206_s8 + $0x70] sm:$0xff] %v1312_v52  ;;  %v900_v54 = vmul.f32 1.442695, %v857_v0  ;;  %808 = vst [vmem:[%s2204_s7 + $0x98] sm:$0xff] %v755_v47  ;;  %v757_v55 = vadd.f32 %v756_v53, %v1920_v50 }
 0x2bb   :  { %v760_v56 = vpop.f32.mrf.mxu0 }
 0x2bc   :  { %1319 = vpow2.f32 %v900_v54  ;;  %833 = vst [vmem:[%s2205_s9 + $0x98] sm:$0xff] %v757_v55  ;;  %v858_v57 = vmul.f32 0.5, %v757_v55  ;;  %v761_v58 = vadd.f32 %v760_v56, %v1918_v35 }
 0x2bd   :  { %v1314_v59 = vpop.eup %1313  ;;  %v762_v60 = vpop.f32.mrf.mxu0 }
 0x2be   :  { %929 = vst [vmem:[%s2206_s8 + $0x78] sm:$0xff] %v1314_v59  ;;  %v902_v61 = vmul.f32 1.442695, %v858_v57  ;;  %809 = vst [vmem:[%s2204_s7 + $0xa0] sm:$0xff] %v761_v58  ;;  %v763_v62 = vadd.f32 %v762_v60, %v1920_v50 }
 0x2bf   :  { %v766_v63 = vpop.f32.mrf.mxu0 }
 0x2c0   :  { %1321 = vpow2.f32 %v902_v61  ;;  %834 = vst [vmem:[%s2205_s9 + $0xa0] sm:$0xff] %v763_v62  ;;  %v859_v1 = vmul.f32 0.5, %v763_v62  ;;  %v767_v2 = vadd.f32 %v766_v63, %v1918_v35 }
 0x2c1   :  { %v1316_v4 = vpop.eup %1315  ;;  %v768_v5 = vpop.f32.mrf.mxu0 }
 0x2c2   :  { %930 = vst [vmem:[%s2206_s8 + $0x80] sm:$0xff] %v1316_v4  ;;  %v904_v6 = vmul.f32 1.442695, %v859_v1  ;;  %810 = vst [vmem:[%s2204_s7 + $0xa8] sm:$0xff] %v767_v2  ;;  %v769_v7 = vadd.f32 %v768_v5, %v1920_v50 }
 0x2c3   :  { %v772_v21 = vpop.f32.mrf.mxu0 }
 0x2c4   :  { %1323 = vpow2.f32 %v904_v6  ;;  %835 = vst [vmem:[%s2205_s9 + $0xa8] sm:$0xff] %v769_v7  ;;  %v860_v8 = vmul.f32 0.5, %v769_v7  ;;  %v773_v9 = vadd.f32 %v772_v21, %v1918_v35 }
 0x2c5   :  { %v1318_v10 = vpop.eup %1317  ;;  %v774_v11 = vpop.f32.mrf.mxu0 }
 0x2c6   :  { %931 = vst [vmem:[%s2206_s8 + $0x88] sm:$0xff] %v1318_v10  ;;  %v906_v12 = vmul.f32 1.442695, %v860_v8  ;;  %811 = vst [vmem:[%s2204_s7 + $0xb0] sm:$0xff] %v773_v9  ;;  %v775_v13 = vadd.f32 %v774_v11, %v1920_v50 }
 0x2c7   :  { %v778_v14 = vpop.f32.mrf.mxu0 }
 0x2c8   :  { %1325 = vpow2.f32 %v906_v12  ;;  %836 = vst [vmem:[%s2205_s9 + $0xb0] sm:$0xff] %v775_v13  ;;  %v861_v15 = vmul.f32 0.5, %v775_v13  ;;  %v779_v16 = vadd.f32 %v778_v14, %v1918_v35 }
 0x2c9   :  { %v1320_v17 = vpop.eup %1319  ;;  %v780_v18 = vpop.f32.mrf.mxu0 }
 0x2ca   :  { %932 = vst [vmem:[%s2206_s8 + $0x90] sm:$0xff] %v1320_v17  ;;  %v908_v19 = vmul.f32 1.442695, %v861_v15  ;;  %812 = vst [vmem:[%s2204_s7 + $0xb8] sm:$0xff] %v779_v16  ;;  %v781_v20 = vadd.f32 %v780_v18, %v1920_v50 }
 0x2cb   :  { %v784_v22 = vpop.f32.mrf.mxu0 }
 0x2cc   :  { %1327 = vpow2.f32 %v908_v19  ;;  %837 = vst [vmem:[%s2205_s9 + $0xb8] sm:$0xff] %v781_v20  ;;  %v862_v23 = vmul.f32 0.5, %v781_v20  ;;  %v785_v24 = vadd.f32 %v784_v22, %v1918_v35 }
 0x2cd   :  { %v1322_v25 = vpop.eup %1321  ;;  %v786_v26 = vpop.f32.mrf.mxu0 }
 0x2ce   :  { %933 = vst [vmem:[%s2206_s8 + $0x98] sm:$0xff] %v1322_v25  ;;  %v910_v27 = vmul.f32 1.442695, %v862_v23  ;;  %813 = vst [vmem:[%s2204_s7 + $0xc0] sm:$0xff] %v785_v24  ;;  %v787_v28 = vadd.f32 %v786_v26, %v1920_v50 }
 0x2d0   :  { %1329 = vpow2.f32 %v910_v27  ;;  %838 = vst [vmem:[%s2205_s9 + $0xc0] sm:$0xff] %v787_v28  ;;  %v863_v30 = vmul.f32 0.5, %v787_v28 }
 0x2d1   :  { %v1324_v35 = vpop.eup %1323 }
 0x2d2   :  { %934 = vst [vmem:[%s2206_s8 + $0xa0] sm:$0xff] %v1324_v35  ;;  %v912_v31 = vmul.f32 1.442695, %v863_v30 }
 0x2d4   :  { %1331 = vpow2.f32 %v912_v31 }
 0x2d5   :  { %v1326_v32 = vpop.eup %1325 }
 0x2d6   :  { %935 = vst [vmem:[%s2206_s8 + $0xa8] sm:$0xff] %v1326_v32 }
 0x2d9   :  { %v1328_v33 = vpop.eup %1327 }
 0x2da   :  { %936 = vst [vmem:[%s2206_s8 + $0xb0] sm:$0xff] %v1328_v33 }
 0x2dd   :  { %v1330_v50 = vpop.eup %1329 }
 0x2de   :  { %937 = vst [vmem:[%s2206_s8 + $0xb8] sm:$0xff] %v1330_v50 }
 0x2e1   :  { %v1332_v34 = vpop.eup %1331 }
 0x2e2   :  { %938 = vst [vmem:[%s2206_s8 + $0xc0] sm:$0xff] %v1332_v34 }

</bundles_post_ra>
